<compile_context>
chip_gen: v5e
topology: v5e:2x2
jax: 0.10.0
libtpu: 0.0.40
codegen_flags: <defaults>
</compile_context>

<pallas_src>
import functools

import numpy as np
import jax
import jax.numpy as jnp
from jax.experimental import pallas as pl
from jax.experimental.pallas import tpu as pltpu

# ------------------------- config (mirrors `opt`) ---------------------------
NC_IM = 3
NFC = 8
MIN_NFC = 8
KER = 3
NUM_LAYER = 5
EPS = 1e-5
LRELU_SLOPE = 0.2

_VMEM_SPEC = pl.BlockSpec(memory_space=pltpu.MemorySpace.VMEM)


# --------------------------- fused Pallas kernel -----------------------------
def make_fused_kernel(n, w0, n_blocks, counts, ind):
    """Whole-generator kernel.

    Activations are (NFC, n): channels on sublanes, flattened (batch,row,col)
    grid on lanes (n is 128-padded).  The current activation lives in a
    lane-padded VMEM scratch `hpad` (NFC, n+pad) whose pad columns are zero,
    so conv tap (di, dj) is simply the window hpad[:, di*w0+dj : +n].  The 9
    windows are stacked into a (9*NFC, n) scratch and each layer is a single
    (Cout, 72) x (72, n) MXU matmul.  Only the valid region of the embedded
    H0 x W0 grid is meaningful; BN stats use a precomputed validity mask.
    """
    yoff = ind * w0 + ind                               # skip-crop lane shift
    taps = [di * w0 + dj for di in range(KER) for dj in range(KER)]

    def kernel(*refs):
        x_ref, y_ref, m_ref = refs[:3]
        prm = refs[3:3 + 3 * n_blocks + 2]
        o_ref = refs[3 + 3 * n_blocks + 2]
        hpad_ref = refs[3 + 3 * n_blocks + 3]           # (NFC, n + pad)
        stk_ref = refs[3 + 3 * n_blocks + 4]            # (9*NFC, n)

        # Zero once: pad lanes beyond n stay zero for every layer, so wrapped
        # window reads only ever see finite zeros (and only on masked lanes).
        hpad_ref[...] = jnp.zeros_like(hpad_ref)
        hpad_ref[:, :n] = x_ref[...]

        def stack_taps():
            for t, off in enumerate(taps):
                stk_ref[t * NFC:(t + 1) * NFC, :] = hpad_ref[:, pl.ds(off, n)]

        for blk in range(n_blocks):
            w_ref, g_ref, be_ref = prm[3 * blk:3 * blk + 3]
            stack_taps()
            # one MXU matmul per layer, contraction depth 9*NFC = 72
            z = jnp.dot(w_ref[...], stk_ref[...],
                        preferred_element_type=jnp.float32)       # (NFC, n)
            # Training-mode BatchNorm over valid positions only (one pass).
            # The conv bias cancels inside (z+b) - mean(z+b) and is skipped.
            maskf = m_ref[blk:blk + 1, :]                          # (1, n)
            inv_cnt = 1.0 / counts[blk]
            zm = z * maskf
            s1 = jnp.sum(zm, axis=1, keepdims=True)
            s2 = jnp.sum(zm * z, axis=1, keepdims=True)
            mean = s1 * inv_cnt
            var = s2 * inv_cnt - mean * mean
            scale = g_ref[...] * jax.lax.rsqrt(var + EPS)          # (NFC, 1)
            shift = be_ref[...] - mean * scale
            a = z * scale + shift                                  # BN as FMA
            hpad_ref[:, :n] = jnp.maximum(a, LRELU_SLOPE * a)      # LeakyReLU

        # tail: conv + bias + tanh + skip-add of the center-cropped y
        wt_ref, bt_ref = prm[3 * n_blocks], prm[3 * n_blocks + 1]
        stack_taps()
        # hpad is no longer needed as an activation buffer -> reuse its first
        # NC_IM rows (pad columns still zero) to window-shift the skip input.
        hpad_ref[0:NC_IM, :n] = y_ref[...]
        z = jnp.dot(wt_ref[...], stk_ref[...],
                    preferred_element_type=jnp.float32) + bt_ref[...]
        o_ref[...] = jnp.tanh(z) + hpad_ref[0:NC_IM, pl.ds(yoff, n)]

    return kernel


# ------------------------------- JAX wrapper ---------------------------------
def generator_forward(x_nchw, y_nchw, params):
    """Pallas implementation of GeneratorConcatSkip2CleanAdd.forward(x, y)."""
    b, c, h0, w0 = x_nchw.shape
    n_blocks = len(params["blocks"])
    s0 = h0 * w0
    n_valid = b * s0
    n = ((n_valid + 127) // 128) * 128            # lane-dense (multiple of 128)

    # layout glue: NCHW -> channel-major flattened grid (C, B*H0*W0),
    # zero-padded to NFC channels (matches the zero-padded head weight) and
    # to n lanes.
    x2d = jnp.transpose(x_nchw, (1, 0, 2, 3)).reshape(c, n_valid)
    x2d = jnp.pad(x2d, ((0, NFC - c), (0, n - n_valid)))
    y2d = jnp.transpose(y_nchw, (1, 0, 2, 3)).reshape(y_nchw.shape[1], n_valid)
    y2d = jnp.pad(y2d, ((0, 0), (0, n - n_valid)))

    # per-block validity masks over the embedded grid (trace-time constants)
    s_idx = np.arange(s0, dtype=np.int64)
    row = s_idx // w0
    col = s_idx % w0
    masks_np = np.zeros((n_blocks, n), np.float32)
    counts = []
    for blk in range(n_blocks):
        sh = (KER - 1) * (blk + 1)
        hv, wv = h0 - sh, w0 - sh
        m = ((row < hv) & (col < wv)).astype(np.float32)
        masks_np[blk, :n_valid] = np.tile(m, b)
        counts.append(float(b * hv * wv))
    masks = jnp.asarray(masks_np)

    shrink = (KER - 1) * (n_blocks + 1)
    ind = shrink // 2                              # center-crop offset

    inputs = [x2d, y2d, masks]
    for blk in params["blocks"]:
        inputs += [blk["w"], blk["gamma"], blk["beta"]]
    inputs += [params["tail"]["w"], params["tail"]["b"]]
    tail_cout = params["tail"]["w"].shape[0]

    # padded-activation scratch width: big enough for the largest tap window
    # and for the skip-crop window, rounded up to a lane multiple.
    pad_extra = max((KER - 1) * w0 + (KER - 1), ind * w0 + ind)
    hpad_w = ((n + pad_extra + 127) // 128) * 128

    out2d = pl.pallas_call(
        make_fused_kernel(n, w0, n_blocks, counts, ind),
        out_shape=jax.ShapeDtypeStruct((tail_cout, n), jnp.float32),
        in_specs=[_VMEM_SPEC] * len(inputs),
        out_specs=_VMEM_SPEC,
        scratch_shapes=[
            pltpu.VMEM((NFC, hpad_w), jnp.float32),          # padded activation
            pltpu.VMEM((KER * KER * NFC, n), jnp.float32),   # stacked taps
        ],
    )(*inputs)

    # crop the valid region out of the embedded grid (tiny pure-JAX slice)
    out = out2d[:, :n_valid].reshape(tail_cout, b, h0, w0).transpose(1, 0, 2, 3)
    return out[:, :, :h0 - shrink, :w0 - shrink]


# ------------------------ deterministic parameter init ----------------------
def _weight_to_stacked(w_oihw, cin_pad):
    """PyTorch OIHW conv weight -> (Cout, K*K*cin_pad) tap-stacked layout.

    Column block t = di*K + dj holds w[:, :, di, dj] (input channels
    zero-padded to cin_pad), matching the in-kernel tap stacking order."""
    cout, cin, k, _ = w_oihw.shape
    if cin < cin_pad:
        w_oihw = jnp.pad(w_oihw, ((0, 0), (0, cin_pad - cin), (0, 0), (0, 0)))
    return jnp.transpose(w_oihw, (0, 2, 3, 1)).reshape(cout, k * k * cin_pad)


def init_params(key):
    # channel plan from the module's __init__
    chans = [(NC_IM, NFC)]
    nch = NFC
    for i in range(NUM_LAYER - 2):
        nch = NFC // (2 ** (i + 1))
        chans.append((max(2 * nch, MIN_NFC), max(nch, MIN_NFC)))
    tail_in, tail_out = max(nch, MIN_NFC), NC_IM

    blocks, raw_blocks = [], []
    for (cin, cout) in chans:
        assert cout == NFC and cin <= NFC, "uniform-kernel assumption"
        key, kw, kb, kg, kbt = jax.random.split(key, 5)
        w = 0.1 * jax.random.normal(kw, (cout, cin, KER, KER), jnp.float32)
        bconv = 0.05 * jax.random.normal(kb, (cout,), jnp.float32)
        gamma = 1.0 + 0.1 * jax.random.normal(kg, (cout,), jnp.float32)
        beta = 0.1 * jax.random.normal(kbt, (cout,), jnp.float32)
        raw_blocks.append((w, bconv, gamma, beta))
        # the conv bias is a mathematical no-op in front of training-mode BN,
        # so the fused kernel only consumes (w, gamma, beta).
        blocks.append(dict(w=_weight_to_stacked(w, NFC),
                           gamma=gamma[:, None], beta=beta[:, None]))

    key, kw, kb = jax.random.split(key, 3)
    tw = 0.1 * jax.random.normal(kw, (tail_out, tail_in, KER, KER), jnp.float32)
    tb = 0.05 * jax.random.normal(kb, (tail_out,), jnp.float32)
    params = dict(blocks=blocks,
                  tail=dict(w=_weight_to_stacked(tw, NFC), b=tb[:, None]))
    raw = dict(blocks=raw_blocks, tail=(tw, tb))
    return params, raw


# --------------------------- pure-JAX reference ------------------------------
def reference_forward(x, y, raw):
    h = x
    dn = ("NCHW", "OIHW", "NCHW")
    for (w, b, g, bt) in raw["blocks"]:
        h = jax.lax.conv_general_dilated(h, w, (1, 1), "VALID",
                                         dimension_numbers=dn)
        h = h + b[None, :, None, None]
        mean = jnp.mean(h, axis=(0, 2, 3), keepdims=True)
        var = jnp.mean((h - mean) ** 2, axis=(0, 2, 3), keepdims=True)
        h = (h - mean) * jax.lax.rsqrt(var + EPS)
        h = h * g[None, :, None, None] + bt[None, :, None, None]
        h = jnp.where(h >= 0, h, LRELU_SLOPE * h)
    tw, tb = raw["tail"]
    h = jax.lax.conv_general_dilated(h, tw, (1, 1), "VALID",
                                     dimension_numbers=dn)
    h = jnp.tanh(h + tb[None, :, None, None])
    ind = (y.shape[2] - h.shape[2]) // 2
    yc = y[:, :, ind:y.shape[2] - ind, ind:y.shape[3] - ind]
    return h + yc


# ----------------------------------- main ------------------------------------
if __name__ == "__main__":
    key = jax.random.PRNGKey(0)
    key, kx, ky = jax.random.split(key, 3)

    x = jax.random.normal(kx, (2, NC_IM, 16, 16), jnp.float32)   # NCHW
    y = jax.random.normal(ky, (2, NC_IM, 16, 16), jnp.float32)   # NCHW skip

    params, raw = init_params(key)

    fwd = jax.jit(functools.partial(generator_forward, params=params))
    out = jax.block_until_ready(fwd(x, y))

    assert out.shape == (2, NC_IM, 6, 6), out.shape

    ref = reference_forward(x, y, raw)
    err = float(jnp.max(jnp.abs(out - ref)))
    assert jnp.allclose(out, ref, atol=2e-3, rtol=2e-3), err

    print("KERNEL_OK")
</pallas_src>

<mosaic_0001>
module attributes {stable_mosaic.version = 11 : i64} {
  func.func @kernel(%arg0: memref<8x512xf32, #tpu.memory_space<vmem>>, %arg1: memref<3x512xf32, #tpu.memory_space<vmem>>, %arg2: memref<4x512xf32, #tpu.memory_space<vmem>>, %arg3: memref<8x72xf32, #tpu.memory_space<vmem>>, %arg4: memref<8x1xf32, #tpu.memory_space<vmem>>, %arg5: memref<8x1xf32, #tpu.memory_space<vmem>>, %arg6: memref<8x72xf32, #tpu.memory_space<vmem>>, %arg7: memref<8x1xf32, #tpu.memory_space<vmem>>, %arg8: memref<8x1xf32, #tpu.memory_space<vmem>>, %arg9: memref<8x72xf32, #tpu.memory_space<vmem>>, %arg10: memref<8x1xf32, #tpu.memory_space<vmem>>, %arg11: memref<8x1xf32, #tpu.memory_space<vmem>>, %arg12: memref<8x72xf32, #tpu.memory_space<vmem>>, %arg13: memref<8x1xf32, #tpu.memory_space<vmem>>, %arg14: memref<8x1xf32, #tpu.memory_space<vmem>>, %arg15: memref<3x72xf32, #tpu.memory_space<vmem>>, %arg16: memref<3x1xf32, #tpu.memory_space<vmem>>, %arg17: memref<3x512xf32, #tpu.memory_space<vmem>>, %arg18: memref<8x640xf32, #tpu.memory_space<vmem>>, %arg19: memref<72x512xf32, #tpu.memory_space<vmem>>) attributes {dimension_semantics = [], scalar_prefetch = 0 : i64, scratch_operands = 2 : i64, tpu.core_type = #tpu.core_type<tc>} {
    %cst = arith.constant 0.000000e+00 : f32
    %0 = vector.broadcast %cst : f32 to vector<8x640xf32>
    %c0 = arith.constant 0 : index
    %c0_0 = arith.constant 0 : index
    %1 = vector.load %arg18[%c0, %c0_0] : memref<8x640xf32, #tpu.memory_space<vmem>>, vector<8x640xf32>
    tpu.vector_store %arg18[%c0, %c0_0], %0 {strides = array<i32>} : memref<8x640xf32, #tpu.memory_space<vmem>>, vector<8x640xf32>,
    %c0_1 = arith.constant 0 : index
    %c0_2 = arith.constant 0 : index
    %2 = vector.load %arg0[%c0_1, %c0_2] : memref<8x512xf32, #tpu.memory_space<vmem>>, vector<8x512xf32>
    %c0_3 = arith.constant 0 : index
    %c0_4 = arith.constant 0 : index
    %3 = vector.load %arg18[%c0_3, %c0_4] : memref<8x640xf32, #tpu.memory_space<vmem>>, vector<8x512xf32>
    tpu.vector_store %arg18[%c0_3, %c0_4], %2 {strides = array<i32>} : memref<8x640xf32, #tpu.memory_space<vmem>>, vector<8x512xf32>,
    %c0_5 = arith.constant 0 : index
    %c0_6 = arith.constant 0 : index
    %4 = vector.load %arg18[%c0_5, %c0_6] : memref<8x640xf32, #tpu.memory_space<vmem>>, vector<8x512xf32>
    %c0_7 = arith.constant 0 : index
    %c0_8 = arith.constant 0 : index
    %5 = vector.load %arg19[%c0_7, %c0_8] : memref<72x512xf32, #tpu.memory_space<vmem>>, vector<8x512xf32>
    tpu.vector_store %arg19[%c0_7, %c0_8], %4 {strides = array<i32>} : memref<72x512xf32, #tpu.memory_space<vmem>>, vector<8x512xf32>,
    %c0_9 = arith.constant 0 : index
    %c1 = arith.constant 1 : index
    %6 = vector.load %arg18[%c0_9, %c1] : memref<8x640xf32, #tpu.memory_space<vmem>>, vector<8x512xf32>
    %c8 = arith.constant 8 : index
    %c0_10 = arith.constant 0 : index
    %7 = vector.load %arg19[%c8, %c0_10] : memref<72x512xf32, #tpu.memory_space<vmem>>, vector<8x512xf32>
    tpu.vector_store %arg19[%c8, %c0_10], %6 {strides = array<i32>} : memref<72x512xf32, #tpu.memory_space<vmem>>, vector<8x512xf32>,
    %c0_11 = arith.constant 0 : index
    %c2 = arith.constant 2 : index
    %8 = vector.load %arg18[%c0_11, %c2] : memref<8x640xf32, #tpu.memory_space<vmem>>, vector<8x512xf32>
    %c16 = arith.constant 16 : index
    %c0_12 = arith.constant 0 : index
    %9 = vector.load %arg19[%c16, %c0_12] : memref<72x512xf32, #tpu.memory_space<vmem>>, vector<8x512xf32>
    tpu.vector_store %arg19[%c16, %c0_12], %8 {strides = array<i32>} : memref<72x512xf32, #tpu.memory_space<vmem>>, vector<8x512xf32>,
    %c0_13 = arith.constant 0 : index
    %c16_14 = arith.constant 16 : index
    %10 = vector.load %arg18[%c0_13, %c16_14] : memref<8x640xf32, #tpu.memory_space<vmem>>, vector<8x512xf32>
    %c24 = arith.constant 24 : index
    %c0_15 = arith.constant 0 : index
    %11 = vector.load %arg19[%c24, %c0_15] : memref<72x512xf32, #tpu.memory_space<vmem>>, vector<8x512xf32>
    tpu.vector_store %arg19[%c24, %c0_15], %10 {strides = array<i32>} : memref<72x512xf32, #tpu.memory_space<vmem>>, vector<8x512xf32>,
    %c0_16 = arith.constant 0 : index
    %c17 = arith.constant 17 : index
    %12 = vector.load %arg18[%c0_16, %c17] : memref<8x640xf32, #tpu.memory_space<vmem>>, vector<8x512xf32>
    %c32 = arith.constant 32 : index
    %c0_17 = arith.constant 0 : index
    %13 = vector.load %arg19[%c32, %c0_17] : memref<72x512xf32, #tpu.memory_space<vmem>>, vector<8x512xf32>
    tpu.vector_store %arg19[%c32, %c0_17], %12 {strides = array<i32>} : memref<72x512xf32, #tpu.memory_space<vmem>>, vector<8x512xf32>,
    %c0_18 = arith.constant 0 : index
    %c18 = arith.constant 18 : index
    %14 = vector.load %arg18[%c0_18, %c18] : memref<8x640xf32, #tpu.memory_space<vmem>>, vector<8x512xf32>
    %c40 = arith.constant 40 : index
    %c0_19 = arith.constant 0 : index
    %15 = vector.load %arg19[%c40, %c0_19] : memref<72x512xf32, #tpu.memory_space<vmem>>, vector<8x512xf32>
    tpu.vector_store %arg19[%c40, %c0_19], %14 {strides = array<i32>} : memref<72x512xf32, #tpu.memory_space<vmem>>, vector<8x512xf32>,
    %c0_20 = arith.constant 0 : index
    %c32_21 = arith.constant 32 : index
    %16 = vector.load %arg18[%c0_20, %c32_21] : memref<8x640xf32, #tpu.memory_space<vmem>>, vector<8x512xf32>
    %c48 = arith.constant 48 : index
    %c0_22 = arith.constant 0 : index
    %17 = vector.load %arg19[%c48, %c0_22] : memref<72x512xf32, #tpu.memory_space<vmem>>, vector<8x512xf32>
    tpu.vector_store %arg19[%c48, %c0_22], %16 {strides = array<i32>} : memref<72x512xf32, #tpu.memory_space<vmem>>, vector<8x512xf32>,
    %c0_23 = arith.constant 0 : index
    %c33 = arith.constant 33 : index
    %18 = vector.load %arg18[%c0_23, %c33] : memref<8x640xf32, #tpu.memory_space<vmem>>, vector<8x512xf32>
    %c56 = arith.constant 56 : index
    %c0_24 = arith.constant 0 : index
    %19 = vector.load %arg19[%c56, %c0_24] : memref<72x512xf32, #tpu.memory_space<vmem>>, vector<8x512xf32>
    tpu.vector_store %arg19[%c56, %c0_24], %18 {strides = array<i32>} : memref<72x512xf32, #tpu.memory_space<vmem>>, vector<8x512xf32>,
    %c0_25 = arith.constant 0 : index
    %c34 = arith.constant 34 : index
    %20 = vector.load %arg18[%c0_25, %c34] : memref<8x640xf32, #tpu.memory_space<vmem>>, vector<8x512xf32>
    %c64 = arith.constant 64 : index
    %c0_26 = arith.constant 0 : index
    %21 = vector.load %arg19[%c64, %c0_26] : memref<72x512xf32, #tpu.memory_space<vmem>>, vector<8x512xf32>
    tpu.vector_store %arg19[%c64, %c0_26], %20 {strides = array<i32>} : memref<72x512xf32, #tpu.memory_space<vmem>>, vector<8x512xf32>,
    %c0_27 = arith.constant 0 : index
    %c0_28 = arith.constant 0 : index
    %22 = vector.load %arg3[%c0_27, %c0_28] : memref<8x72xf32, #tpu.memory_space<vmem>>, vector<8x72xf32>
    %c0_29 = arith.constant 0 : index
    %c0_30 = arith.constant 0 : index
    %23 = vector.load %arg19[%c0_29, %c0_30] : memref<72x512xf32, #tpu.memory_space<vmem>>, vector<72x512xf32>
    %cst_31 = arith.constant dense<0.000000e+00> : vector<8x512xf32>
    %24 = tpu.matmul %22, %23, %cst_31 {dimension_numbers = #tpu.dot_dimension_numbers<[1], [0], [0], [1], [0, 0, 1, 1], [], []>} : vector<8x72xf32>, vector<72x512xf32>, vector<8x512xf32> -> vector<8x512xf32>
    %c0_32 = arith.constant 0 : index
    %c0_33 = arith.constant 0 : index
    %25 = vector.load %arg2[%c0_32, %c0_33] : memref<4x512xf32, #tpu.memory_space<vmem>>, vector<1x512xf32>
    %26 = vector.broadcast %25 : vector<1x512xf32> to vector<8x512xf32>
    %27 = arith.mulf %24, %26 : vector<8x512xf32>
    %cst_34 = arith.constant dense<0.000000e+00> : vector<8xf32>
    %28 = vector.multi_reduction <add>, %27, %cst_34 [1] : vector<8x512xf32> to vector<8xf32>
    %29 = vector.shape_cast %28 : vector<8xf32> to vector<8x1xf32>
    %30 = arith.mulf %27, %24 : vector<8x512xf32>
    %cst_35 = arith.constant dense<0.000000e+00> : vector<8xf32>
    %31 = vector.multi_reduction <add>, %30, %cst_35 [1] : vector<8x512xf32> to vector<8xf32>
    %32 = vector.shape_cast %31 : vector<8xf32> to vector<8x1xf32>
    %cst_36 = arith.constant 0.00255102036 : f32
    %33 = vector.broadcast %cst_36 : f32 to vector<8x1xf32>
    %34 = arith.mulf %29, %33 : vector<8x1xf32>
    %cst_37 = arith.constant 0.00255102036 : f32
    %35 = vector.broadcast %cst_37 : f32 to vector<8x1xf32>
    %36 = arith.mulf %32, %35 : vector<8x1xf32>
    %37 = arith.mulf %34, %34 : vector<8x1xf32>
    %38 = arith.subf %36, %37 : vector<8x1xf32>
    %c0_38 = arith.constant 0 : index
    %c0_39 = arith.constant 0 : index
    %39 = vector.load %arg4[%c0_38, %c0_39] : memref<8x1xf32, #tpu.memory_space<vmem>>, vector<8x1xf32>
    %cst_40 = arith.constant 9.99999974E-6 : f32
    %40 = vector.broadcast %cst_40 : f32 to vector<8x1xf32>
    %41 = arith.addf %38, %40 : vector<8x1xf32>
    %42 = math.rsqrt %41 : vector<8x1xf32>
    %43 = arith.mulf %39, %42 : vector<8x1xf32>
    %c0_41 = arith.constant 0 : index
    %c0_42 = arith.constant 0 : index
    %44 = vector.load %arg5[%c0_41, %c0_42] : memref<8x1xf32, #tpu.memory_space<vmem>>, vector<8x1xf32>
    %45 = arith.mulf %34, %43 : vector<8x1xf32>
    %46 = arith.subf %44, %45 : vector<8x1xf32>
    %47 = vector.broadcast %43 : vector<8x1xf32> to vector<8x512xf32>
    %48 = arith.mulf %24, %47 : vector<8x512xf32>
    %49 = vector.broadcast %46 : vector<8x1xf32> to vector<8x512xf32>
    %50 = arith.addf %48, %49 : vector<8x512xf32>
    %cst_43 = arith.constant 2.000000e-01 : f32
    %51 = vector.broadcast %cst_43 : f32 to vector<8x512xf32>
    %52 = arith.mulf %51, %50 : vector<8x512xf32>
    %53 = arith.maximumf %50, %52 : vector<8x512xf32>
    %c0_44 = arith.constant 0 : index
    %c0_45 = arith.constant 0 : index
    %54 = vector.load %arg18[%c0_44, %c0_45] : memref<8x640xf32, #tpu.memory_space<vmem>>, vector<8x512xf32>
    tpu.vector_store %arg18[%c0_44, %c0_45], %53 {strides = array<i32>} : memref<8x640xf32, #tpu.memory_space<vmem>>, vector<8x512xf32>,
    %c0_46 = arith.constant 0 : index
    %c0_47 = arith.constant 0 : index
    %55 = vector.load %arg18[%c0_46, %c0_47] : memref<8x640xf32, #tpu.memory_space<vmem>>, vector<8x512xf32>
    %c0_48 = arith.constant 0 : index
    %c0_49 = arith.constant 0 : index
    %56 = vector.load %arg19[%c0_48, %c0_49] : memref<72x512xf32, #tpu.memory_space<vmem>>, vector<8x512xf32>
    tpu.vector_store %arg19[%c0_48, %c0_49], %55 {strides = array<i32>} : memref<72x512xf32, #tpu.memory_space<vmem>>, vector<8x512xf32>,
    %c0_50 = arith.constant 0 : index
    %c1_51 = arith.constant 1 : index
    %57 = vector.load %arg18[%c0_50, %c1_51] : memref<8x640xf32, #tpu.memory_space<vmem>>, vector<8x512xf32>
    %c8_52 = arith.constant 8 : index
    %c0_53 = arith.constant 0 : index
    %58 = vector.load %arg19[%c8_52, %c0_53] : memref<72x512xf32, #tpu.memory_space<vmem>>, vector<8x512xf32>
    tpu.vector_store %arg19[%c8_52, %c0_53], %57 {strides = array<i32>} : memref<72x512xf32, #tpu.memory_space<vmem>>, vector<8x512xf32>,
    %c0_54 = arith.constant 0 : index
    %c2_55 = arith.constant 2 : index
    %59 = vector.load %arg18[%c0_54, %c2_55] : memref<8x640xf32, #tpu.memory_space<vmem>>, vector<8x512xf32>
    %c16_56 = arith.constant 16 : index
    %c0_57 = arith.constant 0 : index
    %60 = vector.load %arg19[%c16_56, %c0_57] : memref<72x512xf32, #tpu.memory_space<vmem>>, vector<8x512xf32>
    tpu.vector_store %arg19[%c16_56, %c0_57], %59 {strides = array<i32>} : memref<72x512xf32, #tpu.memory_space<vmem>>, vector<8x512xf32>,
    %c0_58 = arith.constant 0 : index
    %c16_59 = arith.constant 16 : index
    %61 = vector.load %arg18[%c0_58, %c16_59] : memref<8x640xf32, #tpu.memory_space<vmem>>, vector<8x512xf32>
    %c24_60 = arith.constant 24 : index
    %c0_61 = arith.constant 0 : index
    %62 = vector.load %arg19[%c24_60, %c0_61] : memref<72x512xf32, #tpu.memory_space<vmem>>, vector<8x512xf32>
    tpu.vector_store %arg19[%c24_60, %c0_61], %61 {strides = array<i32>} : memref<72x512xf32, #tpu.memory_space<vmem>>, vector<8x512xf32>,
    %c0_62 = arith.constant 0 : index
    %c17_63 = arith.constant 17 : index
    %63 = vector.load %arg18[%c0_62, %c17_63] : memref<8x640xf32, #tpu.memory_space<vmem>>, vector<8x512xf32>
    %c32_64 = arith.constant 32 : index
    %c0_65 = arith.constant 0 : index
    %64 = vector.load %arg19[%c32_64, %c0_65] : memref<72x512xf32, #tpu.memory_space<vmem>>, vector<8x512xf32>
    tpu.vector_store %arg19[%c32_64, %c0_65], %63 {strides = array<i32>} : memref<72x512xf32, #tpu.memory_space<vmem>>, vector<8x512xf32>,
    %c0_66 = arith.constant 0 : index
    %c18_67 = arith.constant 18 : index
    %65 = vector.load %arg18[%c0_66, %c18_67] : memref<8x640xf32, #tpu.memory_space<vmem>>, vector<8x512xf32>
    %c40_68 = arith.constant 40 : index
    %c0_69 = arith.constant 0 : index
    %66 = vector.load %arg19[%c40_68, %c0_69] : memref<72x512xf32, #tpu.memory_space<vmem>>, vector<8x512xf32>
    tpu.vector_store %arg19[%c40_68, %c0_69], %65 {strides = array<i32>} : memref<72x512xf32, #tpu.memory_space<vmem>>, vector<8x512xf32>,
    %c0_70 = arith.constant 0 : index
    %c32_71 = arith.constant 32 : index
    %67 = vector.load %arg18[%c0_70, %c32_71] : memref<8x640xf32, #tpu.memory_space<vmem>>, vector<8x512xf32>
    %c48_72 = arith.constant 48 : index
    %c0_73 = arith.constant 0 : index
    %68 = vector.load %arg19[%c48_72, %c0_73] : memref<72x512xf32, #tpu.memory_space<vmem>>, vector<8x512xf32>
    tpu.vector_store %arg19[%c48_72, %c0_73], %67 {strides = array<i32>} : memref<72x512xf32, #tpu.memory_space<vmem>>, vector<8x512xf32>,
    %c0_74 = arith.constant 0 : index
    %c33_75 = arith.constant 33 : index
    %69 = vector.load %arg18[%c0_74, %c33_75] : memref<8x640xf32, #tpu.memory_space<vmem>>, vector<8x512xf32>
    %c56_76 = arith.constant 56 : index
    %c0_77 = arith.constant 0 : index
    %70 = vector.load %arg19[%c56_76, %c0_77] : memref<72x512xf32, #tpu.memory_space<vmem>>, vector<8x512xf32>
    tpu.vector_store %arg19[%c56_76, %c0_77], %69 {strides = array<i32>} : memref<72x512xf32, #tpu.memory_space<vmem>>, vector<8x512xf32>,
    %c0_78 = arith.constant 0 : index
    %c34_79 = arith.constant 34 : index
    %71 = vector.load %arg18[%c0_78, %c34_79] : memref<8x640xf32, #tpu.memory_space<vmem>>, vector<8x512xf32>
    %c64_80 = arith.constant 64 : index
    %c0_81 = arith.constant 0 : index
    %72 = vector.load %arg19[%c64_80, %c0_81] : memref<72x512xf32, #tpu.memory_space<vmem>>, vector<8x512xf32>
    tpu.vector_store %arg19[%c64_80, %c0_81], %71 {strides = array<i32>} : memref<72x512xf32, #tpu.memory_space<vmem>>, vector<8x512xf32>,
    %c0_82 = arith.constant 0 : index
    %c0_83 = arith.constant 0 : index
    %73 = vector.load %arg6[%c0_82, %c0_83] : memref<8x72xf32, #tpu.memory_space<vmem>>, vector<8x72xf32>
    %c0_84 = arith.constant 0 : index
    %c0_85 = arith.constant 0 : index
    %74 = vector.load %arg19[%c0_84, %c0_85] : memref<72x512xf32, #tpu.memory_space<vmem>>, vector<72x512xf32>
    %cst_86 = arith.constant dense<0.000000e+00> : vector<8x512xf32>
    %75 = tpu.matmul %73, %74, %cst_86 {dimension_numbers = #tpu.dot_dimension_numbers<[1], [0], [0], [1], [0, 0, 1, 1], [], []>} : vector<8x72xf32>, vector<72x512xf32>, vector<8x512xf32> -> vector<8x512xf32>
    %c1_87 = arith.constant 1 : index
    %c0_88 = arith.constant 0 : index
    %76 = vector.load %arg2[%c1_87, %c0_88] : memref<4x512xf32, #tpu.memory_space<vmem>>, vector<1x512xf32>
    %77 = vector.broadcast %76 : vector<1x512xf32> to vector<8x512xf32>
    %78 = arith.mulf %75, %77 : vector<8x512xf32>
    %cst_89 = arith.constant dense<0.000000e+00> : vector<8xf32>
    %79 = vector.multi_reduction <add>, %78, %cst_89 [1] : vector<8x512xf32> to vector<8xf32>
    %80 = vector.shape_cast %79 : vector<8xf32> to vector<8x1xf32>
    %81 = arith.mulf %78, %75 : vector<8x512xf32>
    %cst_90 = arith.constant dense<0.000000e+00> : vector<8xf32>
    %82 = vector.multi_reduction <add>, %81, %cst_90 [1] : vector<8x512xf32> to vector<8xf32>
    %83 = vector.shape_cast %82 : vector<8xf32> to vector<8x1xf32>
    %cst_91 = arith.constant 0.00347222225 : f32
    %84 = vector.broadcast %cst_91 : f32 to vector<8x1xf32>
    %85 = arith.mulf %80, %84 : vector<8x1xf32>
    %cst_92 = arith.constant 0.00347222225 : f32
    %86 = vector.broadcast %cst_92 : f32 to vector<8x1xf32>
    %87 = arith.mulf %83, %86 : vector<8x1xf32>
    %88 = arith.mulf %85, %85 : vector<8x1xf32>
    %89 = arith.subf %87, %88 : vector<8x1xf32>
    %c0_93 = arith.constant 0 : index
    %c0_94 = arith.constant 0 : index
    %90 = vector.load %arg7[%c0_93, %c0_94] : memref<8x1xf32, #tpu.memory_space<vmem>>, vector<8x1xf32>
    %cst_95 = arith.constant 9.99999974E-6 : f32
    %91 = vector.broadcast %cst_95 : f32 to vector<8x1xf32>
    %92 = arith.addf %89, %91 : vector<8x1xf32>
    %93 = math.rsqrt %92 : vector<8x1xf32>
    %94 = arith.mulf %90, %93 : vector<8x1xf32>
    %c0_96 = arith.constant 0 : index
    %c0_97 = arith.constant 0 : index
    %95 = vector.load %arg8[%c0_96, %c0_97] : memref<8x1xf32, #tpu.memory_space<vmem>>, vector<8x1xf32>
    %96 = arith.mulf %85, %94 : vector<8x1xf32>
    %97 = arith.subf %95, %96 : vector<8x1xf32>
    %98 = vector.broadcast %94 : vector<8x1xf32> to vector<8x512xf32>
    %99 = arith.mulf %75, %98 : vector<8x512xf32>
    %100 = vector.broadcast %97 : vector<8x1xf32> to vector<8x512xf32>
    %101 = arith.addf %99, %100 : vector<8x512xf32>
    %cst_98 = arith.constant 2.000000e-01 : f32
    %102 = vector.broadcast %cst_98 : f32 to vector<8x512xf32>
    %103 = arith.mulf %102, %101 : vector<8x512xf32>
    %104 = arith.maximumf %101, %103 : vector<8x512xf32>
    %c0_99 = arith.constant 0 : index
    %c0_100 = arith.constant 0 : index
    %105 = vector.load %arg18[%c0_99, %c0_100] : memref<8x640xf32, #tpu.memory_space<vmem>>, vector<8x512xf32>
    tpu.vector_store %arg18[%c0_99, %c0_100], %104 {strides = array<i32>} : memref<8x640xf32, #tpu.memory_space<vmem>>, vector<8x512xf32>,
    %c0_101 = arith.constant 0 : index
    %c0_102 = arith.constant 0 : index
    %106 = vector.load %arg18[%c0_101, %c0_102] : memref<8x640xf32, #tpu.memory_space<vmem>>, vector<8x512xf32>
    %c0_103 = arith.constant 0 : index
    %c0_104 = arith.constant 0 : index
    %107 = vector.load %arg19[%c0_103, %c0_104] : memref<72x512xf32, #tpu.memory_space<vmem>>, vector<8x512xf32>
    tpu.vector_store %arg19[%c0_103, %c0_104], %106 {strides = array<i32>} : memref<72x512xf32, #tpu.memory_space<vmem>>, vector<8x512xf32>,
    %c0_105 = arith.constant 0 : index
    %c1_106 = arith.constant 1 : index
    %108 = vector.load %arg18[%c0_105, %c1_106] : memref<8x640xf32, #tpu.memory_space<vmem>>, vector<8x512xf32>
    %c8_107 = arith.constant 8 : index
    %c0_108 = arith.constant 0 : index
    %109 = vector.load %arg19[%c8_107, %c0_108] : memref<72x512xf32, #tpu.memory_space<vmem>>, vector<8x512xf32>
    tpu.vector_store %arg19[%c8_107, %c0_108], %108 {strides = array<i32>} : memref<72x512xf32, #tpu.memory_space<vmem>>, vector<8x512xf32>,
    %c0_109 = arith.constant 0 : index
    %c2_110 = arith.constant 2 : index
    %110 = vector.load %arg18[%c0_109, %c2_110] : memref<8x640xf32, #tpu.memory_space<vmem>>, vector<8x512xf32>
    %c16_111 = arith.constant 16 : index
    %c0_112 = arith.constant 0 : index
    %111 = vector.load %arg19[%c16_111, %c0_112] : memref<72x512xf32, #tpu.memory_space<vmem>>, vector<8x512xf32>
    tpu.vector_store %arg19[%c16_111, %c0_112], %110 {strides = array<i32>} : memref<72x512xf32, #tpu.memory_space<vmem>>, vector<8x512xf32>,
    %c0_113 = arith.constant 0 : index
    %c16_114 = arith.constant 16 : index
    %112 = vector.load %arg18[%c0_113, %c16_114] : memref<8x640xf32, #tpu.memory_space<vmem>>, vector<8x512xf32>
    %c24_115 = arith.constant 24 : index
    %c0_116 = arith.constant 0 : index
    %113 = vector.load %arg19[%c24_115, %c0_116] : memref<72x512xf32, #tpu.memory_space<vmem>>, vector<8x512xf32>
    tpu.vector_store %arg19[%c24_115, %c0_116], %112 {strides = array<i32>} : memref<72x512xf32, #tpu.memory_space<vmem>>, vector<8x512xf32>,
    %c0_117 = arith.constant 0 : index
    %c17_118 = arith.constant 17 : index
    %114 = vector.load %arg18[%c0_117, %c17_118] : memref<8x640xf32, #tpu.memory_space<vmem>>, vector<8x512xf32>
    %c32_119 = arith.constant 32 : index
    %c0_120 = arith.constant 0 : index
    %115 = vector.load %arg19[%c32_119, %c0_120] : memref<72x512xf32, #tpu.memory_space<vmem>>, vector<8x512xf32>
    tpu.vector_store %arg19[%c32_119, %c0_120], %114 {strides = array<i32>} : memref<72x512xf32, #tpu.memory_space<vmem>>, vector<8x512xf32>,
    %c0_121 = arith.constant 0 : index
    %c18_122 = arith.constant 18 : index
    %116 = vector.load %arg18[%c0_121, %c18_122] : memref<8x640xf32, #tpu.memory_space<vmem>>, vector<8x512xf32>
    %c40_123 = arith.constant 40 : index
    %c0_124 = arith.constant 0 : index
    %117 = vector.load %arg19[%c40_123, %c0_124] : memref<72x512xf32, #tpu.memory_space<vmem>>, vector<8x512xf32>
    tpu.vector_store %arg19[%c40_123, %c0_124], %116 {strides = array<i32>} : memref<72x512xf32, #tpu.memory_space<vmem>>, vector<8x512xf32>,
    %c0_125 = arith.constant 0 : index
    %c32_126 = arith.constant 32 : index
    %118 = vector.load %arg18[%c0_125, %c32_126] : memref<8x640xf32, #tpu.memory_space<vmem>>, vector<8x512xf32>
    %c48_127 = arith.constant 48 : index
    %c0_128 = arith.constant 0 : index
    %119 = vector.load %arg19[%c48_127, %c0_128] : memref<72x512xf32, #tpu.memory_space<vmem>>, vector<8x512xf32>
    tpu.vector_store %arg19[%c48_127, %c0_128], %118 {strides = array<i32>} : memref<72x512xf32, #tpu.memory_space<vmem>>, vector<8x512xf32>,
    %c0_129 = arith.constant 0 : index
    %c33_130 = arith.constant 33 : index
    %120 = vector.load %arg18[%c0_129, %c33_130] : memref<8x640xf32, #tpu.memory_space<vmem>>, vector<8x512xf32>
    %c56_131 = arith.constant 56 : index
    %c0_132 = arith.constant 0 : index
    %121 = vector.load %arg19[%c56_131, %c0_132] : memref<72x512xf32, #tpu.memory_space<vmem>>, vector<8x512xf32>
    tpu.vector_store %arg19[%c56_131, %c0_132], %120 {strides = array<i32>} : memref<72x512xf32, #tpu.memory_space<vmem>>, vector<8x512xf32>,
    %c0_133 = arith.constant 0 : index
    %c34_134 = arith.constant 34 : index
    %122 = vector.load %arg18[%c0_133, %c34_134] : memref<8x640xf32, #tpu.memory_space<vmem>>, vector<8x512xf32>
    %c64_135 = arith.constant 64 : index
    %c0_136 = arith.constant 0 : index
    %123 = vector.load %arg19[%c64_135, %c0_136] : memref<72x512xf32, #tpu.memory_space<vmem>>, vector<8x512xf32>
    tpu.vector_store %arg19[%c64_135, %c0_136], %122 {strides = array<i32>} : memref<72x512xf32, #tpu.memory_space<vmem>>, vector<8x512xf32>,
    %c0_137 = arith.constant 0 : index
    %c0_138 = arith.constant 0 : index
    %124 = vector.load %arg9[%c0_137, %c0_138] : memref<8x72xf32, #tpu.memory_space<vmem>>, vector<8x72xf32>
    %c0_139 = arith.constant 0 : index
    %c0_140 = arith.constant 0 : index
    %125 = vector.load %arg19[%c0_139, %c0_140] : memref<72x512xf32, #tpu.memory_space<vmem>>, vector<72x512xf32>
    %cst_141 = arith.constant dense<0.000000e+00> : vector<8x512xf32>
    %126 = tpu.matmul %124, %125, %cst_141 {dimension_numbers = #tpu.dot_dimension_numbers<[1], [0], [0], [1], [0, 0, 1, 1], [], []>} : vector<8x72xf32>, vector<72x512xf32>, vector<8x512xf32> -> vector<8x512xf32>
    %c2_142 = arith.constant 2 : index
    %c0_143 = arith.constant 0 : index
    %127 = vector.load %arg2[%c2_142, %c0_143] : memref<4x512xf32, #tpu.memory_space<vmem>>, vector<1x512xf32>
    %128 = vector.broadcast %127 : vector<1x512xf32> to vector<8x512xf32>
    %129 = arith.mulf %126, %128 : vector<8x512xf32>
    %cst_144 = arith.constant dense<0.000000e+00> : vector<8xf32>
    %130 = vector.multi_reduction <add>, %129, %cst_144 [1] : vector<8x512xf32> to vector<8xf32>
    %131 = vector.shape_cast %130 : vector<8xf32> to vector<8x1xf32>
    %132 = arith.mulf %129, %126 : vector<8x512xf32>
    %cst_145 = arith.constant dense<0.000000e+00> : vector<8xf32>
    %133 = vector.multi_reduction <add>, %132, %cst_145 [1] : vector<8x512xf32> to vector<8xf32>
    %134 = vector.shape_cast %133 : vector<8xf32> to vector<8x1xf32>
    %cst_146 = arith.constant 5.000000e-03 : f32
    %135 = vector.broadcast %cst_146 : f32 to vector<8x1xf32>
    %136 = arith.mulf %131, %135 : vector<8x1xf32>
    %cst_147 = arith.constant 5.000000e-03 : f32
    %137 = vector.broadcast %cst_147 : f32 to vector<8x1xf32>
    %138 = arith.mulf %134, %137 : vector<8x1xf32>
    %139 = arith.mulf %136, %136 : vector<8x1xf32>
    %140 = arith.subf %138, %139 : vector<8x1xf32>
    %c0_148 = arith.constant 0 : index
    %c0_149 = arith.constant 0 : index
    %141 = vector.load %arg10[%c0_148, %c0_149] : memref<8x1xf32, #tpu.memory_space<vmem>>, vector<8x1xf32>
    %cst_150 = arith.constant 9.99999974E-6 : f32
    %142 = vector.broadcast %cst_150 : f32 to vector<8x1xf32>
    %143 = arith.addf %140, %142 : vector<8x1xf32>
    %144 = math.rsqrt %143 : vector<8x1xf32>
    %145 = arith.mulf %141, %144 : vector<8x1xf32>
    %c0_151 = arith.constant 0 : index
    %c0_152 = arith.constant 0 : index
    %146 = vector.load %arg11[%c0_151, %c0_152] : memref<8x1xf32, #tpu.memory_space<vmem>>, vector<8x1xf32>
    %147 = arith.mulf %136, %145 : vector<8x1xf32>
    %148 = arith.subf %146, %147 : vector<8x1xf32>
    %149 = vector.broadcast %145 : vector<8x1xf32> to vector<8x512xf32>
    %150 = arith.mulf %126, %149 : vector<8x512xf32>
    %151 = vector.broadcast %148 : vector<8x1xf32> to vector<8x512xf32>
    %152 = arith.addf %150, %151 : vector<8x512xf32>
    %cst_153 = arith.constant 2.000000e-01 : f32
    %153 = vector.broadcast %cst_153 : f32 to vector<8x512xf32>
    %154 = arith.mulf %153, %152 : vector<8x512xf32>
    %155 = arith.maximumf %152, %154 : vector<8x512xf32>
    %c0_154 = arith.constant 0 : index
    %c0_155 = arith.constant 0 : index
    %156 = vector.load %arg18[%c0_154, %c0_155] : memref<8x640xf32, #tpu.memory_space<vmem>>, vector<8x512xf32>
    tpu.vector_store %arg18[%c0_154, %c0_155], %155 {strides = array<i32>} : memref<8x640xf32, #tpu.memory_space<vmem>>, vector<8x512xf32>,
    %c0_156 = arith.constant 0 : index
    %c0_157 = arith.constant 0 : index
    %157 = vector.load %arg18[%c0_156, %c0_157] : memref<8x640xf32, #tpu.memory_space<vmem>>, vector<8x512xf32>
    %c0_158 = arith.constant 0 : index
    %c0_159 = arith.constant 0 : index
    %158 = vector.load %arg19[%c0_158, %c0_159] : memref<72x512xf32, #tpu.memory_space<vmem>>, vector<8x512xf32>
    tpu.vector_store %arg19[%c0_158, %c0_159], %157 {strides = array<i32>} : memref<72x512xf32, #tpu.memory_space<vmem>>, vector<8x512xf32>,
    %c0_160 = arith.constant 0 : index
    %c1_161 = arith.constant 1 : index
    %159 = vector.load %arg18[%c0_160, %c1_161] : memref<8x640xf32, #tpu.memory_space<vmem>>, vector<8x512xf32>
    %c8_162 = arith.constant 8 : index
    %c0_163 = arith.constant 0 : index
    %160 = vector.load %arg19[%c8_162, %c0_163] : memref<72x512xf32, #tpu.memory_space<vmem>>, vector<8x512xf32>
    tpu.vector_store %arg19[%c8_162, %c0_163], %159 {strides = array<i32>} : memref<72x512xf32, #tpu.memory_space<vmem>>, vector<8x512xf32>,
    %c0_164 = arith.constant 0 : index
    %c2_165 = arith.constant 2 : index
    %161 = vector.load %arg18[%c0_164, %c2_165] : memref<8x640xf32, #tpu.memory_space<vmem>>, vector<8x512xf32>
    %c16_166 = arith.constant 16 : index
    %c0_167 = arith.constant 0 : index
    %162 = vector.load %arg19[%c16_166, %c0_167] : memref<72x512xf32, #tpu.memory_space<vmem>>, vector<8x512xf32>
    tpu.vector_store %arg19[%c16_166, %c0_167], %161 {strides = array<i32>} : memref<72x512xf32, #tpu.memory_space<vmem>>, vector<8x512xf32>,
    %c0_168 = arith.constant 0 : index
    %c16_169 = arith.constant 16 : index
    %163 = vector.load %arg18[%c0_168, %c16_169] : memref<8x640xf32, #tpu.memory_space<vmem>>, vector<8x512xf32>
    %c24_170 = arith.constant 24 : index
    %c0_171 = arith.constant 0 : index
    %164 = vector.load %arg19[%c24_170, %c0_171] : memref<72x512xf32, #tpu.memory_space<vmem>>, vector<8x512xf32>
    tpu.vector_store %arg19[%c24_170, %c0_171], %163 {strides = array<i32>} : memref<72x512xf32, #tpu.memory_space<vmem>>, vector<8x512xf32>,
    %c0_172 = arith.constant 0 : index
    %c17_173 = arith.constant 17 : index
    %165 = vector.load %arg18[%c0_172, %c17_173] : memref<8x640xf32, #tpu.memory_space<vmem>>, vector<8x512xf32>
    %c32_174 = arith.constant 32 : index
    %c0_175 = arith.constant 0 : index
    %166 = vector.load %arg19[%c32_174, %c0_175] : memref<72x512xf32, #tpu.memory_space<vmem>>, vector<8x512xf32>
    tpu.vector_store %arg19[%c32_174, %c0_175], %165 {strides = array<i32>} : memref<72x512xf32, #tpu.memory_space<vmem>>, vector<8x512xf32>,
    %c0_176 = arith.constant 0 : index
    %c18_177 = arith.constant 18 : index
    %167 = vector.load %arg18[%c0_176, %c18_177] : memref<8x640xf32, #tpu.memory_space<vmem>>, vector<8x512xf32>
    %c40_178 = arith.constant 40 : index
    %c0_179 = arith.constant 0 : index
    %168 = vector.load %arg19[%c40_178, %c0_179] : memref<72x512xf32, #tpu.memory_space<vmem>>, vector<8x512xf32>
    tpu.vector_store %arg19[%c40_178, %c0_179], %167 {strides = array<i32>} : memref<72x512xf32, #tpu.memory_space<vmem>>, vector<8x512xf32>,
    %c0_180 = arith.constant 0 : index
    %c32_181 = arith.constant 32 : index
    %169 = vector.load %arg18[%c0_180, %c32_181] : memref<8x640xf32, #tpu.memory_space<vmem>>, vector<8x512xf32>
    %c48_182 = arith.constant 48 : index
    %c0_183 = arith.constant 0 : index
    %170 = vector.load %arg19[%c48_182, %c0_183] : memref<72x512xf32, #tpu.memory_space<vmem>>, vector<8x512xf32>
    tpu.vector_store %arg19[%c48_182, %c0_183], %169 {strides = array<i32>} : memref<72x512xf32, #tpu.memory_space<vmem>>, vector<8x512xf32>,
    %c0_184 = arith.constant 0 : index
    %c33_185 = arith.constant 33 : index
    %171 = vector.load %arg18[%c0_184, %c33_185] : memref<8x640xf32, #tpu.memory_space<vmem>>, vector<8x512xf32>
    %c56_186 = arith.constant 56 : index
    %c0_187 = arith.constant 0 : index
    %172 = vector.load %arg19[%c56_186, %c0_187] : memref<72x512xf32, #tpu.memory_space<vmem>>, vector<8x512xf32>
    tpu.vector_store %arg19[%c56_186, %c0_187], %171 {strides = array<i32>} : memref<72x512xf32, #tpu.memory_space<vmem>>, vector<8x512xf32>,
    %c0_188 = arith.constant 0 : index
    %c34_189 = arith.constant 34 : index
    %173 = vector.load %arg18[%c0_188, %c34_189] : memref<8x640xf32, #tpu.memory_space<vmem>>, vector<8x512xf32>
    %c64_190 = arith.constant 64 : index
    %c0_191 = arith.constant 0 : index
    %174 = vector.load %arg19[%c64_190, %c0_191] : memref<72x512xf32, #tpu.memory_space<vmem>>, vector<8x512xf32>
    tpu.vector_store %arg19[%c64_190, %c0_191], %173 {strides = array<i32>} : memref<72x512xf32, #tpu.memory_space<vmem>>, vector<8x512xf32>,
    %c0_192 = arith.constant 0 : index
    %c0_193 = arith.constant 0 : index
    %175 = vector.load %arg12[%c0_192, %c0_193] : memref<8x72xf32, #tpu.memory_space<vmem>>, vector<8x72xf32>
    %c0_194 = arith.constant 0 : index
    %c0_195 = arith.constant 0 : index
    %176 = vector.load %arg19[%c0_194, %c0_195] : memref<72x512xf32, #tpu.memory_space<vmem>>, vector<72x512xf32>
    %cst_196 = arith.constant dense<0.000000e+00> : vector<8x512xf32>
    %177 = tpu.matmul %175, %176, %cst_196 {dimension_numbers = #tpu.dot_dimension_numbers<[1], [0], [0], [1], [0, 0, 1, 1], [], []>} : vector<8x72xf32>, vector<72x512xf32>, vector<8x512xf32> -> vector<8x512xf32>
    %c3 = arith.constant 3 : index
    %c0_197 = arith.constant 0 : index
    %178 = vector.load %arg2[%c3, %c0_197] : memref<4x512xf32, #tpu.memory_space<vmem>>, vector<1x512xf32>
    %179 = vector.broadcast %178 : vector<1x512xf32> to vector<8x512xf32>
    %180 = arith.mulf %177, %179 : vector<8x512xf32>
    %cst_198 = arith.constant dense<0.000000e+00> : vector<8xf32>
    %181 = vector.multi_reduction <add>, %180, %cst_198 [1] : vector<8x512xf32> to vector<8xf32>
    %182 = vector.shape_cast %181 : vector<8xf32> to vector<8x1xf32>
    %183 = arith.mulf %180, %177 : vector<8x512xf32>
    %cst_199 = arith.constant dense<0.000000e+00> : vector<8xf32>
    %184 = vector.multi_reduction <add>, %183, %cst_199 [1] : vector<8x512xf32> to vector<8xf32>
    %185 = vector.shape_cast %184 : vector<8xf32> to vector<8x1xf32>
    %cst_200 = arith.constant 7.812500e-03 : f32
    %186 = vector.broadcast %cst_200 : f32 to vector<8x1xf32>
    %187 = arith.mulf %182, %186 : vector<8x1xf32>
    %cst_201 = arith.constant 7.812500e-03 : f32
    %188 = vector.broadcast %cst_201 : f32 to vector<8x1xf32>
    %189 = arith.mulf %185, %188 : vector<8x1xf32>
    %190 = arith.mulf %187, %187 : vector<8x1xf32>
    %191 = arith.subf %189, %190 : vector<8x1xf32>
    %c0_202 = arith.constant 0 : index
    %c0_203 = arith.constant 0 : index
    %192 = vector.load %arg13[%c0_202, %c0_203] : memref<8x1xf32, #tpu.memory_space<vmem>>, vector<8x1xf32>
    %cst_204 = arith.constant 9.99999974E-6 : f32
    %193 = vector.broadcast %cst_204 : f32 to vector<8x1xf32>
    %194 = arith.addf %191, %193 : vector<8x1xf32>
    %195 = math.rsqrt %194 : vector<8x1xf32>
    %196 = arith.mulf %192, %195 : vector<8x1xf32>
    %c0_205 = arith.constant 0 : index
    %c0_206 = arith.constant 0 : index
    %197 = vector.load %arg14[%c0_205, %c0_206] : memref<8x1xf32, #tpu.memory_space<vmem>>, vector<8x1xf32>
    %198 = arith.mulf %187, %196 : vector<8x1xf32>
    %199 = arith.subf %197, %198 : vector<8x1xf32>
    %200 = vector.broadcast %196 : vector<8x1xf32> to vector<8x512xf32>
    %201 = arith.mulf %177, %200 : vector<8x512xf32>
    %202 = vector.broadcast %199 : vector<8x1xf32> to vector<8x512xf32>
    %203 = arith.addf %201, %202 : vector<8x512xf32>
    %cst_207 = arith.constant 2.000000e-01 : f32
    %204 = vector.broadcast %cst_207 : f32 to vector<8x512xf32>
    %205 = arith.mulf %204, %203 : vector<8x512xf32>
    %206 = arith.maximumf %203, %205 : vector<8x512xf32>
    %c0_208 = arith.constant 0 : index
    %c0_209 = arith.constant 0 : index
    %207 = vector.load %arg18[%c0_208, %c0_209] : memref<8x640xf32, #tpu.memory_space<vmem>>, vector<8x512xf32>
    tpu.vector_store %arg18[%c0_208, %c0_209], %206 {strides = array<i32>} : memref<8x640xf32, #tpu.memory_space<vmem>>, vector<8x512xf32>,
    %c0_210 = arith.constant 0 : index
    %c0_211 = arith.constant 0 : index
    %208 = vector.load %arg18[%c0_210, %c0_211] : memref<8x640xf32, #tpu.memory_space<vmem>>, vector<8x512xf32>
    %c0_212 = arith.constant 0 : index
    %c0_213 = arith.constant 0 : index
    %209 = vector.load %arg19[%c0_212, %c0_213] : memref<72x512xf32, #tpu.memory_space<vmem>>, vector<8x512xf32>
    tpu.vector_store %arg19[%c0_212, %c0_213], %208 {strides = array<i32>} : memref<72x512xf32, #tpu.memory_space<vmem>>, vector<8x512xf32>,
    %c0_214 = arith.constant 0 : index
    %c1_215 = arith.constant 1 : index
    %210 = vector.load %arg18[%c0_214, %c1_215] : memref<8x640xf32, #tpu.memory_space<vmem>>, vector<8x512xf32>
    %c8_216 = arith.constant 8 : index
    %c0_217 = arith.constant 0 : index
    %211 = vector.load %arg19[%c8_216, %c0_217] : memref<72x512xf32, #tpu.memory_space<vmem>>, vector<8x512xf32>
    tpu.vector_store %arg19[%c8_216, %c0_217], %210 {strides = array<i32>} : memref<72x512xf32, #tpu.memory_space<vmem>>, vector<8x512xf32>,
    %c0_218 = arith.constant 0 : index
    %c2_219 = arith.constant 2 : index
    %212 = vector.load %arg18[%c0_218, %c2_219] : memref<8x640xf32, #tpu.memory_space<vmem>>, vector<8x512xf32>
    %c16_220 = arith.constant 16 : index
    %c0_221 = arith.constant 0 : index
    %213 = vector.load %arg19[%c16_220, %c0_221] : memref<72x512xf32, #tpu.memory_space<vmem>>, vector<8x512xf32>
    tpu.vector_store %arg19[%c16_220, %c0_221], %212 {strides = array<i32>} : memref<72x512xf32, #tpu.memory_space<vmem>>, vector<8x512xf32>,
    %c0_222 = arith.constant 0 : index
    %c16_223 = arith.constant 16 : index
    %214 = vector.load %arg18[%c0_222, %c16_223] : memref<8x640xf32, #tpu.memory_space<vmem>>, vector<8x512xf32>
    %c24_224 = arith.constant 24 : index
    %c0_225 = arith.constant 0 : index
    %215 = vector.load %arg19[%c24_224, %c0_225] : memref<72x512xf32, #tpu.memory_space<vmem>>, vector<8x512xf32>
    tpu.vector_store %arg19[%c24_224, %c0_225], %214 {strides = array<i32>} : memref<72x512xf32, #tpu.memory_space<vmem>>, vector<8x512xf32>,
    %c0_226 = arith.constant 0 : index
    %c17_227 = arith.constant 17 : index
    %216 = vector.load %arg18[%c0_226, %c17_227] : memref<8x640xf32, #tpu.memory_space<vmem>>, vector<8x512xf32>
    %c32_228 = arith.constant 32 : index
    %c0_229 = arith.constant 0 : index
    %217 = vector.load %arg19[%c32_228, %c0_229] : memref<72x512xf32, #tpu.memory_space<vmem>>, vector<8x512xf32>
    tpu.vector_store %arg19[%c32_228, %c0_229], %216 {strides = array<i32>} : memref<72x512xf32, #tpu.memory_space<vmem>>, vector<8x512xf32>,
    %c0_230 = arith.constant 0 : index
    %c18_231 = arith.constant 18 : index
    %218 = vector.load %arg18[%c0_230, %c18_231] : memref<8x640xf32, #tpu.memory_space<vmem>>, vector<8x512xf32>
    %c40_232 = arith.constant 40 : index
    %c0_233 = arith.constant 0 : index
    %219 = vector.load %arg19[%c40_232, %c0_233] : memref<72x512xf32, #tpu.memory_space<vmem>>, vector<8x512xf32>
    tpu.vector_store %arg19[%c40_232, %c0_233], %218 {strides = array<i32>} : memref<72x512xf32, #tpu.memory_space<vmem>>, vector<8x512xf32>,
    %c0_234 = arith.constant 0 : index
    %c32_235 = arith.constant 32 : index
    %220 = vector.load %arg18[%c0_234, %c32_235] : memref<8x640xf32, #tpu.memory_space<vmem>>, vector<8x512xf32>
    %c48_236 = arith.constant 48 : index
    %c0_237 = arith.constant 0 : index
    %221 = vector.load %arg19[%c48_236, %c0_237] : memref<72x512xf32, #tpu.memory_space<vmem>>, vector<8x512xf32>
    tpu.vector_store %arg19[%c48_236, %c0_237], %220 {strides = array<i32>} : memref<72x512xf32, #tpu.memory_space<vmem>>, vector<8x512xf32>,
    %c0_238 = arith.constant 0 : index
    %c33_239 = arith.constant 33 : index
    %222 = vector.load %arg18[%c0_238, %c33_239] : memref<8x640xf32, #tpu.memory_space<vmem>>, vector<8x512xf32>
    %c56_240 = arith.constant 56 : index
    %c0_241 = arith.constant 0 : index
    %223 = vector.load %arg19[%c56_240, %c0_241] : memref<72x512xf32, #tpu.memory_space<vmem>>, vector<8x512xf32>
    tpu.vector_store %arg19[%c56_240, %c0_241], %222 {strides = array<i32>} : memref<72x512xf32, #tpu.memory_space<vmem>>, vector<8x512xf32>,
    %c0_242 = arith.constant 0 : index
    %c34_243 = arith.constant 34 : index
    %224 = vector.load %arg18[%c0_242, %c34_243] : memref<8x640xf32, #tpu.memory_space<vmem>>, vector<8x512xf32>
    %c64_244 = arith.constant 64 : index
    %c0_245 = arith.constant 0 : index
    %225 = vector.load %arg19[%c64_244, %c0_245] : memref<72x512xf32, #tpu.memory_space<vmem>>, vector<8x512xf32>
    tpu.vector_store %arg19[%c64_244, %c0_245], %224 {strides = array<i32>} : memref<72x512xf32, #tpu.memory_space<vmem>>, vector<8x512xf32>,
    %c0_246 = arith.constant 0 : index
    %c0_247 = arith.constant 0 : index
    %226 = vector.load %arg1[%c0_246, %c0_247] : memref<3x512xf32, #tpu.memory_space<vmem>>, vector<3x512xf32>
    %c0_248 = arith.constant 0 : index
    %c0_249 = arith.constant 0 : index
    %227 = vector.load %arg18[%c0_248, %c0_249] : memref<8x640xf32, #tpu.memory_space<vmem>>, vector<3x512xf32>
    tpu.vector_store %arg18[%c0_248, %c0_249], %226 {strides = array<i32>} : memref<8x640xf32, #tpu.memory_space<vmem>>, vector<3x512xf32>,
    %c0_250 = arith.constant 0 : index
    %c0_251 = arith.constant 0 : index
    %228 = vector.load %arg15[%c0_250, %c0_251] : memref<3x72xf32, #tpu.memory_space<vmem>>, vector<3x72xf32>
    %c0_252 = arith.constant 0 : index
    %c0_253 = arith.constant 0 : index
    %229 = vector.load %arg19[%c0_252, %c0_253] : memref<72x512xf32, #tpu.memory_space<vmem>>, vector<72x512xf32>
    %cst_254 = arith.constant dense<0.000000e+00> : vector<3x512xf32>
    %230 = tpu.matmul %228, %229, %cst_254 {dimension_numbers = #tpu.dot_dimension_numbers<[1], [0], [0], [1], [0, 0, 1, 1], [], []>} : vector<3x72xf32>, vector<72x512xf32>, vector<3x512xf32> -> vector<3x512xf32>
    %c0_255 = arith.constant 0 : index
    %c0_256 = arith.constant 0 : index
    %231 = vector.load %arg16[%c0_255, %c0_256] : memref<3x1xf32, #tpu.memory_space<vmem>>, vector<3x1xf32>
    %232 = vector.broadcast %231 : vector<3x1xf32> to vector<3x512xf32>
    %233 = arith.addf %230, %232 : vector<3x512xf32>
    %234 = math.tanh %233 : vector<3x512xf32>
    %c0_257 = arith.constant 0 : index
    %c85 = arith.constant 85 : index
    %235 = vector.load %arg18[%c0_257, %c85] : memref<8x640xf32, #tpu.memory_space<vmem>>, vector<3x512xf32>
    %236 = arith.addf %234, %235 : vector<3x512xf32>
    %c0_258 = arith.constant 0 : index
    %c0_259 = arith.constant 0 : index
    %237 = vector.load %arg17[%c0_258, %c0_259] : memref<3x512xf32, #tpu.memory_space<vmem>>, vector<3x512xf32>
    tpu.vector_store %arg17[%c0_258, %c0_259], %236 {strides = array<i32>} : memref<3x512xf32, #tpu.memory_space<vmem>>, vector<3x512xf32>,
    return
  }
}

</mosaic_0001>

<bundles_post_ra>
// kernel: generator_forward.1
= control target key start
LH: loop header
LB: loop body
LE: loop exit
PB: predicated region body
PF: predicated region fallthrough
CT: control target
= control target key end

     0   :  { %v2846_v2 = vmov 0.0   ;;  %s2847_s30 = smov 94   ;;  %s2848_s18 = smov 95   ;;  %vm328_vm0 = vcmask 769024   ;;  %vm295_vm1 = vcmask 777216   ;;  %vm262_vm2 = vcmask 785408   ;;  %s3565_s0 = inlined_call_operand.vmem [shape: f32[8,512], index: 0, kind: input, shape index: {}]   ;;  %s3566_s3 = inlined_call_operand.vmem [shape: f32[8,72], index: 3, kind: input, shape index: {}]   ;;  %s3567_s2 = inlined_call_operand.vmem [shape: f32[4,512], index: 2, kind: input, shape index: {}]   ;;  %s3568_s4 = inlined_call_operand.vmem [shape: f32[8,1], index: 4, kind: input, shape index: {}]   ;;  %s3569_s5 = inlined_call_operand.vmem [shape: f32[8,1], index: 5, kind: input, shape index: {}]   ;;  %s3570_s6 = inlined_call_operand.vmem [shape: f32[8,72], index: 6, kind: input, shape index: {}]   ;;  %s3571_s7 = inlined_call_operand.vmem [shape: f32[8,1], index: 7, kind: input, shape index: {}]   ;;  %s3572_s8 = inlined_call_operand.vmem [shape: f32[8,1], index: 8, kind: input, shape index: {}]   ;;  %s3573_s9 = inlined_call_operand.vmem [shape: f32[8,72], index: 9, kind: input, shape index: {}]   ;;  %s3574_s10 = inlined_call_operand.vmem [shape: f32[8,1], index: 10, kind: input, shape index: {}]   ;;  %s3575_s11 = inlined_call_operand.vmem [shape: f32[8,1], index: 11, kind: input, shape index: {}]   ;;  %s3576_s12 = inlined_call_operand.vmem [shape: f32[8,72], index: 12, kind: input, shape index: {}]   ;;  %s3577_s13 = inlined_call_operand.vmem [shape: f32[8,1], index: 13, kind: input, shape index: {}]   ;;  %s3578_s14 = inlined_call_operand.vmem [shape: f32[8,1], index: 14, kind: input, shape index: {}]   ;;  %s3579_s16 = inlined_call_operand.vmem [shape: f32[3,1], index: 16, kind: input, shape index: {}]   ;;  %s3580_s1 = inlined_call_operand.vmem [shape: f32[3,512], index: 1, kind: input, shape index: {}]   ;;  %s3581_s15 = inlined_call_operand.vmem [shape: f32[3,72], index: 15, kind: input, shape index: {}]   ;;  %s3582_s17 = inlined_call_operand.vmem [shape: f32[3,512], index: 17, kind: output, shape index: {}]  }
   0x1   :  { %3584 = sst [smem:[#allocation4_spill]] %s3565_s0  ;;  %60 = vst [vmem:[#allocation2 + $0x18] sm:$0xff] %v2846_v2  ;;  %s2849_s20 = smov 96   ;;  %vm229_vm3 = vcmask 900096   ;;  %vm196_vm4 = vcmask 908288   ;;  %vm163_vm5 = vcmask 916480  }
   0x2   :  { %3585 = sst [smem:[#allocation5_spill]] %s3566_s3  ;;  %s2850_s21 = smov 110   ;;  %vm130_vm6 = vcmask 1031168   ;;  %vm97_vm7 = vcmask 1039360   ;;  %vm378_vm8 = vcmask 588800  }
   0x3   :  { %s3586_s26 = sld [smem:[#allocation4_spill]]  ;;  %s2851_s22 = smov 111  }
   0x4   :  { %s2852_s23 = smov 112   ;;  %s2853_s24 = smov 126  }
   0x5   :  { %s2854_s25 = smov 127   ;;  %s3587_s28 = sld [smem:[#allocation5_spill]] }
   0x9   :  { %v2950_v0 = vld [vmem:[%s3586_s26 + $0x10] sm:$0xff]  ;;  %v2955_v1 = vld [vmem:[%s3586_s26 + $0x18] sm:$0xff]  ;;  %v2961_v3 = vld [vmem:[%s3586_s26] sm:$0xff] }
   0xa   :  { %v2426_v4 = vpack.i.bf16 %v2955_v1, %v2950_v0  ;;  %v2436_v5 = vpack.i.bf16 %v2961_v3, %v2846_v2  ;;  %v2973_v6 = vld [vmem:[%s3586_s26 + $0x8] sm:$0xff] }
   0xc   :  { %2427 = vrot.lane.b32.xlu0 %v2426_v4, %s2847_s30  ;;  %2437 = vrot.lane.b32.xlu1 %v2436_v5, %s2847_s30 }
   0xd   :  { %2447 = vrot.lane.b32.xlu2 %v2436_v5, %s2848_s18 }
  0x14   :  { %2432 = vrot.lane.b32.xlu0 %v2426_v4, %s2848_s18  ;;  %2442 = vrot.lane.b32.xlu1 %v2426_v4, %s2849_s20 }
  0x15   :  { %320 = vrot.lane.b32.xlu2 %v2973_v6, %s2847_s30 }
  0x1c   :  { %2452 = vrot.lane.b32.xlu0 %v2426_v4, %s2850_s21  ;;  %2457 = vrot.lane.b32.xlu1 %v2436_v5, %s2849_s20 }
  0x1d   :  { %287 = vrot.lane.b32.xlu2 %v2973_v6, %s2848_s18 }
  0x24   :  { %2462 = vrot.lane.b32.xlu0 %v2426_v4, %s2851_s22  ;;  %2467 = vrot.lane.b32.xlu1 %v2436_v5, %s2850_s21 }
  0x25   :  { %254 = vrot.lane.b32.xlu2 %v2973_v6, %s2849_s20 }
  0x2c   :  { %2472 = vrot.lane.b32.xlu0 %v2426_v4, %s2852_s23  ;;  %2477 = vrot.lane.b32.xlu1 %v2436_v5, %s2851_s22 }
  0x2d   :  { %221 = vrot.lane.b32.xlu2 %v2973_v6, %s2850_s21 }
  0x34   :  { %2482 = vrot.lane.b32.xlu0 %v2426_v4, %s2853_s24  ;;  %2487 = vrot.lane.b32.xlu1 %v2436_v5, %s2852_s23 }
  0x35   :  { %188 = vrot.lane.b32.xlu2 %v2973_v6, %s2851_s22 }
  0x3c   :  { %2492 = vrot.lane.b32.xlu0 %v2426_v4, %s2854_s25  ;;  %2497 = vrot.lane.b32.xlu1 %v2436_v5, %s2853_s24 }
  0x3d   :  { %155 = vrot.lane.b32.xlu2 %v2973_v6, %s2852_s23 }
  0x44   :  { %122 = vrot.lane.b32.xlu1 %v2973_v6, %s2853_s24  ;;  %2502 = vrot.lane.b32.xlu0 %v2436_v5, %s2854_s25 }
  0x45   :  { %89 = vrot.lane.b32.xlu2 %v2973_v6, %s2854_s25 }
  0x67   :  { %v2448_v7 = vpop.permute.xlu2 %2447 }
  0x68   :  { %v2450_v10 = vunpack.i.h.bf16 %v2448_v7  ;;  %v2449_v23 = vunpack.i.l.bf16 %v2448_v7 }
  0x6f   :  { %v321_v8 = vpop.permute.xlu2 %320 }
  0x77   :  { %v288_v9 = vpop.permute.xlu2 %287 }
  0x78   :  { %v296_v22 = vsel %vm295_vm1, %v2450_v10, %v288_v9 }
  0x7e   :  { %v2428_v11 = vpop.permute.xlu0 %2427  ;;  %v2438_v12 = vpop.permute.xlu1 %2437 }
  0x7f   :  { %v2430_v13 = vunpack.i.h.bf16 %v2428_v11  ;;  %v2429_v14 = vunpack.i.l.bf16 %v2428_v11  ;;  %v2440_v15 = vunpack.i.h.bf16 %v2438_v12  ;;  %v2439_v16 = vunpack.i.l.bf16 %v2438_v12  ;;  %v255_v17 = vpop.permute.xlu2 %254 }
  0x81   :  { %v330_v18 = vsel %vm328_vm0, %v321_v8, %v2429_v14  ;;  %v331_v19 = vsel %vm328_vm0, %v2429_v14, %v2430_v13  ;;  %v332_v20 = vsel %vm328_vm0, %v2430_v13, %v2439_v16  ;;  %v329_v21 = vsel %vm328_vm0, %v2440_v15, %v321_v8 }
  0x82   :  { %409 = vmatpush.msra.mxu1 %v330_v18  ;;  %429 = vmatpush.msra.mxu2 %v331_v19 }
  0x83   :  { %449 = vmatpush.msra.mxu3 %v332_v20  ;;  %389 = vmatpush.msra.mxu0 %v329_v21 }
  0x85   :  { %390 = vmatpush.msra.mxu0 %v296_v22 }
  0x86   :  { %v2433_v24 = vpop.permute.xlu0 %2432  ;;  %v2443_v25 = vpop.permute.xlu1 %2442 }
  0x87   :  { %v2435_v26 = vunpack.i.h.bf16 %v2433_v24  ;;  %v2434_v27 = vunpack.i.l.bf16 %v2433_v24  ;;  %v2445_v28 = vunpack.i.h.bf16 %v2443_v25  ;;  %v2444_v29 = vunpack.i.l.bf16 %v2443_v25  ;;  %v222_v34 = vpop.permute.xlu2 %221  ;;  %v341_v25 = vld [vmem:[%s3587_s28] sm:$0xff] }
  0x89   :  { %v297_v30 = vsel %vm295_vm1, %v288_v9, %v2434_v27  ;;  %v298_v31 = vsel %vm295_vm1, %v2434_v27, %v2435_v26  ;;  %v299_v32 = vsel %vm295_vm1, %v2435_v26, %v2449_v23  ;;  %v264_v33 = vsel %vm262_vm2, %v255_v17, %v2444_v29 }
  0x8a   :  { %410 = vmatpush.msra.mxu1 %v297_v30  ;;  %430 = vmatpush.msra.mxu2 %v298_v31  ;;  %v265_v35 = vsel %vm262_vm2, %v2444_v29, %v2445_v28 }
  0x8b   :  { %450 = vmatpush.msra.mxu3 %v299_v32 }
  0x8c   :  { %411 = vmatpush.msra.mxu1 %v264_v33  ;;  %431 = vmatpush.msra.mxu2 %v265_v35 }
  0x8e   :  { %v2453_v36 = vpop.permute.xlu0 %2452  ;;  %v2458_v37 = vpop.permute.xlu1 %2457 }
  0x8f   :  { %v2455_v38 = vunpack.i.h.bf16 %v2453_v36  ;;  %v2454_v39 = vunpack.i.l.bf16 %v2453_v36  ;;  %v2460_v40 = vunpack.i.h.bf16 %v2458_v37  ;;  %v2459_v41 = vunpack.i.l.bf16 %v2458_v37  ;;  %v189_v46 = vpop.permute.xlu2 %188  ;;  %v462_v36 = vld [vmem:[%s3567_s2] ss:$4 sm:$0xf] }
  0x90   :  { %v464_v37 = vperm.slane %v462_v36, 0 }
  0x91   :  { %v231_v42 = vsel %vm229_vm3, %v222_v34, %v2454_v39  ;;  %v232_v43 = vsel %vm229_vm3, %v2454_v39, %v2455_v38  ;;  %v266_v44 = vsel %vm262_vm2, %v2445_v28, %v2459_v41  ;;  %v263_v45 = vsel %vm262_vm2, %v2460_v40, %v255_v17 }
  0x92   :  { %412 = vmatpush.msra.mxu1 %v231_v42  ;;  %432 = vmatpush.msra.mxu2 %v232_v43  ;;  %v466_v39 = vperm.slane %v462_v36, 2 }
  0x93   :  { %451 = vmatpush.msra.mxu3 %v266_v44  ;;  %391 = vmatpush.msra.mxu0 %v263_v45  ;;  %v467_v45 = vperm.slane %v462_v36, 3 }
  0x96   :  { %v2463_v47 = vpop.permute.xlu0 %2462  ;;  %v2468_v48 = vpop.permute.xlu1 %2467 }
  0x97   :  { %v2465_v49 = vunpack.i.h.bf16 %v2463_v47  ;;  %v2464_v50 = vunpack.i.l.bf16 %v2463_v47  ;;  %v2470_v51 = vunpack.i.h.bf16 %v2468_v48  ;;  %v2469_v52 = vunpack.i.l.bf16 %v2468_v48  ;;  %v156_v57 = vpop.permute.xlu2 %155 }
  0x99   :  { %v198_v53 = vsel %vm196_vm4, %v189_v46, %v2464_v50  ;;  %v199_v54 = vsel %vm196_vm4, %v2464_v50, %v2465_v49  ;;  %v233_v55 = vsel %vm229_vm3, %v2455_v38, %v2469_v52  ;;  %v230_v56 = vsel %vm229_vm3, %v2470_v51, %v222_v34 }
  0x9a   :  { %413 = vmatpush.msra.mxu1 %v198_v53  ;;  %433 = vmatpush.msra.mxu2 %v199_v54  ;;  %v465_v38 = vperm.slane %v462_v36, 1 }
  0x9b   :  { %452 = vmatpush.msra.mxu3 %v233_v55  ;;  %392 = vmatpush.msra.mxu0 %v230_v56  ;;  %v2855_v56 = vmov 0  }
  0x9c   :  { %2506 = vset.pattern.permute.xlu2 %v2855_v56  ;;  %2587 = vset.pattern.permute.xlu0 %v2855_v56 }
  0x9d   :  { %2748 = vset.pattern.permute.xlu1 %v2855_v56 }
  0x9e   :  { %v2473_v58 = vpop.permute.xlu0 %2472  ;;  %v2478_v59 = vpop.permute.xlu1 %2477 }
  0x9f   :  { %v2475_v60 = vunpack.i.h.bf16 %v2473_v58  ;;  %v2474_v61 = vunpack.i.l.bf16 %v2473_v58  ;;  %v2480_v62 = vunpack.i.h.bf16 %v2478_v59  ;;  %v2479_v63 = vunpack.i.l.bf16 %v2478_v59  ;;  %v90_v27 = vpop.permute.xlu2 %89 }
  0xa1   :  { %v165_v4 = vsel %vm163_vm5, %v156_v57, %v2474_v61  ;;  %v166_v5 = vsel %vm163_vm5, %v2474_v61, %v2475_v60  ;;  %v200_v7 = vsel %vm196_vm4, %v2465_v49, %v2479_v63  ;;  %v197_v8 = vsel %vm196_vm4, %v2480_v62, %v189_v46 }
  0xa2   :  { %414 = vmatpush.msra.mxu1 %v165_v4  ;;  %434 = vmatpush.msra.mxu2 %v166_v5 }
  0xa3   :  { %453 = vmatpush.msra.mxu3 %v200_v7  ;;  %393 = vmatpush.msra.mxu0 %v197_v8 }
  0xa6   :  { %v2483_v9 = vpop.permute.xlu0 %2482  ;;  %v2488_v10 = vpop.permute.xlu1 %2487 }
  0xa7   :  { %v2485_v11 = vunpack.i.h.bf16 %v2483_v9  ;;  %v2484_v12 = vunpack.i.l.bf16 %v2483_v9  ;;  %v2490_v13 = vunpack.i.h.bf16 %v2488_v10  ;;  %v2489_v14 = vunpack.i.l.bf16 %v2488_v10  ;;  %v494_v10 = vld [vmem:[%s3568_s4] sm:$0xff] }
  0xa9   :  { %v133_v15 = vsel %vm130_vm6, %v2484_v12, %v2485_v11  ;;  %v167_v16 = vsel %vm163_vm5, %v2475_v60, %v2489_v14  ;;  %v164_v17 = vsel %vm163_vm5, %v2490_v13, %v156_v57 }
  0xaa   :  { %435 = vmatpush.msra.mxu2 %v133_v15  ;;  %454 = vmatpush.msra.mxu3 %v167_v16  ;;  %v507_v15 = vld [vmem:[%s3569_s5] sm:$0xff] }
  0xab   :  { %394 = vmatpush.msra.mxu0 %v164_v17 }
  0xae   :  { %v2493_v18 = vpop.permute.xlu0 %2492  ;;  %v2498_v19 = vpop.permute.xlu1 %2497 }
  0xaf   :  { %v2495_v20 = vunpack.i.h.bf16 %v2493_v18  ;;  %v2494_v21 = vunpack.i.l.bf16 %v2493_v18  ;;  %v2499_v22 = vunpack.i.l.bf16 %v2498_v19  ;;  %v2500_v26 = vunpack.i.h.bf16 %v2498_v19 }
  0xb1   :  { %v100_v23 = vsel %vm97_vm7, %v2494_v21, %v2495_v20  ;;  %v134_v24 = vsel %vm130_vm6, %v2485_v11, %v2499_v22  ;;  %v99_v35 = vsel %vm97_vm7, %v90_v27, %v2494_v21 }
  0xb2   :  { %436 = vmatpush.msra.mxu2 %v100_v23  ;;  %455 = vmatpush.msra.mxu3 %v134_v24 }
  0xb4   :  { %437 = vmatpush.msra.mxu2 %v2950_v0 }
  0xb5   :  { %2394 = vmatmul.msk.f32.vlgmr.msra.gmra.mxu2 %vm378_vm8, %v341_v25 }
  0xb6   :  { %v123_v28 = vpop.permute.xlu1 %122  ;;  %v2503_v29 = vpop.permute.xlu0 %2502 }
  0xb7   :  { %v2505_v30 = vunpack.i.h.bf16 %v2503_v29  ;;  %v2504_v31 = vunpack.i.l.bf16 %v2503_v29  ;;  %v131_v32 = vsel %vm130_vm6, %v2500_v26, %v123_v28  ;;  %v132_v33 = vsel %vm130_vm6, %v123_v28, %v2484_v12 }
  0xb8   :  { %395 = vmatpush.msra.mxu0 %v131_v32  ;;  %415 = vmatpush.msra.mxu1 %v132_v33 }
  0xb9   :  { %v98_v34 = vsel %vm97_vm7, %v2505_v30, %v90_v27  ;;  %v101_v0 = vsel %vm97_vm7, %v2495_v20, %v2504_v31 }
  0xba   :  { %396 = vmatpush.msra.mxu0 %v98_v34  ;;  %416 = vmatpush.msra.mxu1 %v99_v35 }
  0xbb   :  { %456 = vmatpush.msra.mxu3 %v101_v0 }
  0xbc   :  { %397 = vmatpush.msra.mxu0 %v2961_v3  ;;  %417 = vmatpush.msra.mxu1 %v2973_v6 }
  0xbd   :  { %457 = vmatpush.msra.mxu3 %v2955_v1  ;;  %2392 = vmatmul.msk.f32.vlgmr.msra.gmra.mxu0 %vm378_vm8, %v341_v25 }
  0xbe   :  { %2393 = vmatmul.msk.f32.vlgmr.msra.gmra.mxu1 %vm378_vm8, %v341_v25  ;;  %2395 = vmatmul.msk.f32.vlgmr.msra.gmra.mxu3 %vm378_vm8, %v341_v25 }
 0x138   :  { %v439_v40 = vpop.f32.mrf.mxu2 }
 0x139   :  { %v474_v43 = vmul.f32 %v466_v39, %v439_v40 }
 0x13a   :  { %v399_v41 = vpop.f32.mrf.mxu0 }
 0x13b   :  { %v472_v3 = vmul.f32 %v464_v37, %v399_v41  ;;  %v419_v42 = vpop.f32.mrf.mxu1  ;;  %v483_v47 = vmul.f32 %v474_v43, %v439_v40 }
 0x13c   :  { %v473_v6 = vmul.f32 %v465_v38, %v419_v42 }
 0x13d   :  { %v481_v1 = vmul.f32 %v472_v3, %v399_v41 }
 0x13e   :  { %v482_v44 = vmul.f32 %v473_v6, %v419_v42  ;;  %v476_v46 = vadd.f32 %v473_v6, %v472_v3 }
 0x140   :  { %v477_v48 = vadd.f32 %v476_v46, %v474_v43  ;;  %v485_v49 = vadd.f32 %v482_v44, %v481_v1 }
 0x141   :  { %v459_v50 = vpop.f32.mrf.mxu3 }
 0x142   :  { %v475_v51 = vmul.f32 %v467_v45, %v459_v50  ;;  %v486_v54 = vadd.f32 %v485_v49, %v483_v47 }
 0x144   :  { %v478_v52 = vadd.f32 %v477_v48, %v475_v51  ;;  %v484_v53 = vmul.f32 %v475_v51, %v459_v50 }
 0x146   :  { %479 = vadd.xlane.f32.xlu0 %v478_v52  ;;  %v487_v55 = vadd.f32 %v486_v54, %v484_v53 }
 0x148   :  { %488 = vadd.xlane.f32.xlu1 %v487_v55 }
 0x1b9   :  { %v480_v57 = vpop.xlane.xlu0 %479 }
 0x1ba   :  { %v490_v58 = vmul.f32 0.0025510204, %v480_v57 }
 0x1bb   :  { %v489_v59 = vpop.xlane.xlu1 %488 }
 0x1bc   :  { %v492_v60 = vmul.f32 %v490_v58, %v490_v58  ;;  %v491_v61 = vmul.f32 0.0025510204, %v489_v59 }
 0x1be   :  { %v493_v62 = vsub.f32 %v491_v61, %v492_v60 }
 0x1c0   :  { %v495_v63 = vadd.f32 1e-05, %v493_v62 }
 0x1c2   :  { %2829 = vrsqrt.f32 %v495_v63  ;;  %vm502_vm10 = vweird.f32 %v495_v63 }
 0x1c8   :  { %v2830_v4 = vpop.eup %2829 }
 0x1c9   :  { %v497_v5 = vmul.f32 %v2830_v4, %v495_v63  ;;  %vm503_vm9 = vweird.f32 %v2830_v4 }
 0x1ca   :  { %vm504_vm11 = vmor %vm502_vm10, %vm503_vm9 }
 0x1cb   :  { %v498_v7 = vmul.f32 %v2830_v4, %v497_v5 }
 0x1cd   :  { %v499_v8 = vmul.f32 0.5, %v498_v7 }
 0x1cf   :  { %v500_v9 = vsub.f32 1.5, %v499_v8 }
 0x1d1   :  { %v501_v11 = vmul.f32 %v2830_v4, %v500_v9 }
 0x1d3   :  { %v505_v12 = vsel %vm504_vm11, %v2830_v4, %v501_v11 }
 0x1d4   :  { %v506_v13 = vmul.f32 %v505_v12, %v494_v10 }
 0x1d6   :  { %512 = vperm.xlu2 %2506, %v506_v13   ;;  %v508_v14 = vmul.f32 %v506_v13, %v490_v58 }
 0x1d8   :  { %v509_v16 = vsub.f32 %v507_v15, %v508_v14 }
 0x1de   :  { %521 = vperm.xlu2 %2506, %v509_v16  }
 0x230   :  { %v513_v17 = vpop.permute.xlu2 %512 }
 0x231   :  { %v515_v18 = vmul.f32 %v513_v17, %v399_v41  ;;  %v516_v19 = vmul.f32 %v513_v17, %v419_v42  ;;  %v517_v20 = vmul.f32 %v513_v17, %v439_v40  ;;  %v518_v21 = vmul.f32 %v513_v17, %v459_v50 }
 0x238   :  { %v522_v22 = vpop.permute.xlu2 %521 }
 0x239   :  { %v524_v23 = vadd.f32 %v522_v22, %v515_v18  ;;  %v525_v24 = vadd.f32 %v522_v22, %v516_v19  ;;  %v526_v25 = vadd.f32 %v522_v22, %v517_v20  ;;  %v527_v26 = vadd.f32 %v522_v22, %v518_v21 }
 0x23b   :  { %v528_v27 = vmul.f32 0.2, %v524_v23  ;;  %v529_v28 = vmul.f32 0.2, %v525_v24  ;;  %v530_v29 = vmul.f32 0.2, %v526_v25 }
 0x23c   :  { %v531_v30 = vmul.f32 0.2, %v527_v26 }
 0x23d   :  { %v3056_v31 = vmax.f32 %v524_v23, %v528_v27  ;;  %v3058_v32 = vmax.f32 %v525_v24, %v529_v28  ;;  %v3060_v33 = vmax.f32 %v526_v25, %v530_v29 }
 0x23e   :  { %v3062_v34 = vmax.f32 %v527_v26, %v531_v30 }
 0x23f   :  { %784 = vrot.lane.b32.xlu1 %v3058_v32, %s2847_s30  ;;  %v2527_v35 = vpack.i.bf16 %v3056_v31, %v2846_v2 }
 0x240   :  { %v2507_v0 = vpack.i.bf16 %v3062_v34, %v3060_v33 }
 0x241   :  { %2528 = vrot.lane.b32.xlu0 %v2527_v35, %s2848_s18 }
 0x242   :  { %2508 = vrot.lane.b32.xlu2 %v2507_v0, %s2847_s30 }
 0x247   :  { %2548 = vrot.lane.b32.xlu1 %v2527_v35, %s2850_s21 }
 0x249   :  { %752 = vrot.lane.b32.xlu0 %v3058_v32, %s2848_s18 }
 0x24a   :  { %2513 = vrot.lane.b32.xlu2 %v2507_v0, %s2848_s18 }
 0x24f   :  { %2558 = vrot.lane.b32.xlu1 %v2527_v35, %s2851_s22 }
 0x251   :  { %720 = vrot.lane.b32.xlu0 %v3058_v32, %s2849_s20 }
 0x252   :  { %2518 = vrot.lane.b32.xlu2 %v2527_v35, %s2847_s30 }
 0x257   :  { %2568 = vrot.lane.b32.xlu1 %v2527_v35, %s2852_s23 }
 0x259   :  { %688 = vrot.lane.b32.xlu0 %v3058_v32, %s2850_s21 }
 0x25a   :  { %2523 = vrot.lane.b32.xlu2 %v2507_v0, %s2849_s20 }
 0x25f   :  { %2578 = vrot.lane.b32.xlu1 %v2527_v35, %s2853_s24 }
 0x261   :  { %656 = vrot.lane.b32.xlu0 %v3058_v32, %s2851_s22 }
 0x262   :  { %2533 = vrot.lane.b32.xlu2 %v2507_v0, %s2850_s21 }
 0x267   :  { %592 = vrot.lane.b32.xlu1 %v3058_v32, %s2853_s24 }
 0x269   :  { %624 = vrot.lane.b32.xlu0 %v3058_v32, %s2852_s23 }
 0x26a   :  { %2538 = vrot.lane.b32.xlu2 %v2527_v35, %s2849_s20 }
 0x271   :  { %560 = vrot.lane.b32.xlu0 %v3058_v32, %s2854_s25 }
 0x272   :  { %2543 = vrot.lane.b32.xlu2 %v2507_v0, %s2851_s22 }
 0x27a   :  { %2553 = vrot.lane.b32.xlu2 %v2507_v0, %s2852_s23 }
 0x282   :  { %2563 = vrot.lane.b32.xlu2 %v2507_v0, %s2853_s24 }
 0x28a   :  { %2573 = vrot.lane.b32.xlu2 %v2507_v0, %s2854_s25 }
 0x292   :  { %2583 = vrot.lane.b32.xlu2 %v2527_v35, %s2854_s25 }
 0x29c   :  { %v2509_v36 = vpop.permute.xlu2 %2508 }
 0x29d   :  { %v2511_v37 = vunpack.i.h.bf16 %v2509_v36  ;;  %v2510_v38 = vunpack.i.l.bf16 %v2509_v36 }
 0x29f   :  { %v794_v39 = vsel %vm328_vm0, %v2510_v38, %v2511_v37 }
 0x2a0   :  { %891 = vmatpush.msrb.mxu2 %v794_v39 }
 0x2a4   :  { %v2514_v40 = vpop.permute.xlu2 %2513 }
 0x2a5   :  { %v2516_v41 = vunpack.i.h.bf16 %v2514_v40  ;;  %v2515_v3 = vunpack.i.l.bf16 %v2514_v40 }
 0x2a7   :  { %v762_v42 = vsel %vm295_vm1, %v2515_v3, %v2516_v41 }
 0x2a8   :  { %892 = vmatpush.msrb.mxu2 %v762_v42 }
 0x2ac   :  { %v2519_v6 = vpop.permute.xlu2 %2518 }
 0x2ad   :  { %v2520_v43 = vunpack.i.l.bf16 %v2519_v6  ;;  %v2521_v44 = vunpack.i.h.bf16 %v2519_v6 }
 0x2af   :  { %v795_v1 = vsel %vm328_vm0, %v2511_v37, %v2520_v43 }
 0x2b0   :  { %911 = vmatpush.msrb.mxu3 %v795_v1 }
 0x2b1   :  { %v785_v45 = vpop.permute.xlu1 %784 }
 0x2b2   :  { %v793_v46 = vsel %vm328_vm0, %v785_v45, %v2510_v38  ;;  %v792_v47 = vsel %vm328_vm0, %v2521_v44, %v785_v45 }
 0x2b3   :  { %871 = vmatpush.msrb.mxu1 %v793_v46  ;;  %851 = vmatpush.msrb.mxu0 %v792_v47  ;;  %v2529_v48 = vpop.permute.xlu0 %2528 }
 0x2b4   :  { %v2524_v49 = vpop.permute.xlu2 %2523  ;;  %v2530_v50 = vunpack.i.l.bf16 %v2529_v48  ;;  %v2531_v56 = vunpack.i.h.bf16 %v2529_v48 }
 0x2b5   :  { %v2526_v51 = vunpack.i.h.bf16 %v2524_v49  ;;  %v2525_v52 = vunpack.i.l.bf16 %v2524_v49 }
 0x2b6   :  { %v763_v53 = vsel %vm295_vm1, %v2516_v41, %v2530_v50 }
 0x2b7   :  { %v730_v54 = vsel %vm262_vm2, %v2525_v52, %v2526_v51  ;;  %912 = vmatpush.msrb.mxu3 %v763_v53 }
 0x2b8   :  { %893 = vmatpush.msrb.mxu2 %v730_v54 }
 0x2b9   :  { %v2549_v55 = vpop.permute.xlu1 %2548 }
 0x2ba   :  { %v2550_v11 = vunpack.i.l.bf16 %v2549_v55  ;;  %v2551_v16 = vunpack.i.h.bf16 %v2549_v55 }
 0x2bb   :  { %v753_v57 = vpop.permute.xlu0 %752 }
 0x2bc   :  { %v2534_v58 = vpop.permute.xlu2 %2533  ;;  %v760_v59 = vsel %vm295_vm1, %v2531_v56, %v753_v57  ;;  %v761_v60 = vsel %vm295_vm1, %v753_v57, %v2515_v3  ;;  %v804_v57 = vld [vmem:[%s3570_s6] sm:$0xff] }
 0x2bd   :  { %v2536_v61 = vunpack.i.h.bf16 %v2534_v58  ;;  %v2535_v62 = vunpack.i.l.bf16 %v2534_v58  ;;  %852 = vmatpush.msrb.mxu0 %v760_v59  ;;  %872 = vmatpush.msrb.mxu1 %v761_v60 }
 0x2bf   :  { %v698_v63 = vsel %vm229_vm3, %v2535_v62, %v2536_v61  ;;  %v699_v14 = vsel %vm229_vm3, %v2536_v61, %v2550_v11 }
 0x2c0   :  { %894 = vmatpush.msrb.mxu2 %v698_v63 }
 0x2c1   :  { %v2559_v4 = vpop.permute.xlu1 %2558 }
 0x2c2   :  { %v2560_v21 = vunpack.i.l.bf16 %v2559_v4  ;;  %v2561_v27 = vunpack.i.h.bf16 %v2559_v4 }
 0x2c3   :  { %v721_v5 = vpop.permute.xlu0 %720 }
 0x2c4   :  { %v2539_v7 = vpop.permute.xlu2 %2538  ;;  %v729_v8 = vsel %vm262_vm2, %v721_v5, %v2525_v52 }
 0x2c5   :  { %v2541_v9 = vunpack.i.h.bf16 %v2539_v7  ;;  %v2540_v10 = vunpack.i.l.bf16 %v2539_v7  ;;  %873 = vmatpush.msrb.mxu1 %v729_v8 }
 0x2c7   :  { %v728_v12 = vsel %vm262_vm2, %v2541_v9, %v721_v5  ;;  %v731_v13 = vsel %vm262_vm2, %v2526_v51, %v2540_v10 }
 0x2c8   :  { %853 = vmatpush.msrb.mxu0 %v728_v12  ;;  %913 = vmatpush.msrb.mxu3 %v731_v13 }
 0x2c9   :  { %v2569_v15 = vpop.permute.xlu1 %2568 }
 0x2ca   :  { %914 = vmatpush.msrb.mxu3 %v699_v14  ;;  %v2570_v0 = vunpack.i.l.bf16 %v2569_v15  ;;  %v2571_v40 = vunpack.i.h.bf16 %v2569_v15 }
 0x2cb   :  { %v689_v17 = vpop.permute.xlu0 %688 }
 0x2cc   :  { %v2544_v18 = vpop.permute.xlu2 %2543  ;;  %v696_v19 = vsel %vm229_vm3, %v2551_v16, %v689_v17  ;;  %v697_v20 = vsel %vm229_vm3, %v689_v17, %v2535_v62 }
 0x2cd   :  { %v2546_v22 = vunpack.i.h.bf16 %v2544_v18  ;;  %v2545_v23 = vunpack.i.l.bf16 %v2544_v18  ;;  %854 = vmatpush.msrb.mxu0 %v696_v19  ;;  %874 = vmatpush.msrb.mxu1 %v697_v20 }
 0x2cf   :  { %v666_v24 = vsel %vm196_vm4, %v2545_v23, %v2546_v22  ;;  %v667_v25 = vsel %vm196_vm4, %v2546_v22, %v2560_v21 }
 0x2d0   :  { %895 = vmatpush.msrb.mxu2 %v666_v24  ;;  %915 = vmatpush.msrb.mxu3 %v667_v25 }
 0x2d1   :  { %v2579_v26 = vpop.permute.xlu1 %2578 }
 0x2d2   :  { %v2581_v42 = vunpack.i.h.bf16 %v2579_v26  ;;  %v2580_v44 = vunpack.i.l.bf16 %v2579_v26 }
 0x2d3   :  { %v657_v28 = vpop.permute.xlu0 %656 }
 0x2d4   :  { %v2554_v29 = vpop.permute.xlu2 %2553  ;;  %v664_v30 = vsel %vm196_vm4, %v2561_v27, %v657_v28  ;;  %v665_v35 = vsel %vm196_vm4, %v657_v28, %v2545_v23 }
 0x2d5   :  { %v2556_v36 = vunpack.i.h.bf16 %v2554_v29  ;;  %v2555_v37 = vunpack.i.l.bf16 %v2554_v29  ;;  %855 = vmatpush.msrb.mxu0 %v664_v30  ;;  %875 = vmatpush.msrb.mxu1 %v665_v35 }
 0x2d7   :  { %v634_v38 = vsel %vm163_vm5, %v2555_v37, %v2556_v36  ;;  %v635_v39 = vsel %vm163_vm5, %v2556_v36, %v2570_v0 }
 0x2d8   :  { %896 = vmatpush.msrb.mxu2 %v634_v38  ;;  %916 = vmatpush.msrb.mxu3 %v635_v39  ;;  %v957_v38 = vld [vmem:[%s3571_s7] sm:$0xff] }
 0x2d9   :  { %v593_v41 = vpop.permute.xlu1 %592 }
 0x2da   :  { %v600_v47 = vsel %vm130_vm6, %v2581_v42, %v593_v41  ;;  %v970_v42 = vld [vmem:[%s3572_s8] sm:$0xff] }
 0x2db   :  { %v625_v3 = vpop.permute.xlu0 %624 }
 0x2dc   :  { %v2564_v6 = vpop.permute.xlu2 %2563  ;;  %v632_v43 = vsel %vm163_vm5, %v2571_v40, %v625_v3  ;;  %v633_v1 = vsel %vm163_vm5, %v625_v3, %v2555_v37 }
 0x2dd   :  { %v2566_v45 = vunpack.i.h.bf16 %v2564_v6  ;;  %v2565_v46 = vunpack.i.l.bf16 %v2564_v6  ;;  %856 = vmatpush.msrb.mxu0 %v632_v43  ;;  %876 = vmatpush.msrb.mxu1 %v633_v1 }
 0x2df   :  { %857 = vmatpush.msrb.mxu0 %v600_v47  ;;  %v601_v48 = vsel %vm130_vm6, %v593_v41, %v2565_v46  ;;  %v602_v49 = vsel %vm130_vm6, %v2565_v46, %v2566_v45  ;;  %v603_v50 = vsel %vm130_vm6, %v2566_v45, %v2580_v44 }
 0x2e0   :  { %877 = vmatpush.msrb.mxu1 %v601_v48  ;;  %897 = vmatpush.msrb.mxu2 %v602_v49 }
 0x2e1   :  { %917 = vmatpush.msrb.mxu3 %v603_v50 }
 0x2e3   :  { %v561_v54 = vpop.permute.xlu0 %560 }
 0x2e4   :  { %v2574_v51 = vpop.permute.xlu2 %2573 }
 0x2e5   :  { %v2576_v52 = vunpack.i.h.bf16 %v2574_v51  ;;  %v2575_v53 = vunpack.i.l.bf16 %v2574_v51 }
 0x2e7   :  { %v569_v55 = vsel %vm97_vm7, %v561_v54, %v2575_v53  ;;  %v570_v56 = vsel %vm97_vm7, %v2575_v53, %v2576_v52 }
 0x2e8   :  { %878 = vmatpush.msrb.mxu1 %v569_v55  ;;  %898 = vmatpush.msrb.mxu2 %v570_v56 }
 0x2ea   :  { %879 = vmatpush.msrb.mxu1 %v3058_v32  ;;  %899 = vmatpush.msrb.mxu2 %v3060_v33  ;;  %v2400_v32 = vld [vmem:[%s3567_s2 + $0x1] ss:$4 sm:$0xf] }
 0x2eb   :  { %2398 = vmatmul.msk.f32.vlgmr.msrb.gmra.mxu2 %vm378_vm8, %v804_v57  ;;  %2397 = vmatmul.msk.f32.vlgmr.msrb.gmra.mxu1 %vm378_vm8, %v804_v57  ;;  %v928_v33 = vperm.slane %v2400_v32, 1  ;;  %v927_v4 = vperm.slane %v2400_v32, 0  ;;  %v929_v7 = vperm.slane %v2400_v32, 2  ;;  %v930_v12 = vperm.slane %v2400_v32, 3 }
 0x2ec   :  { %v2584_v58 = vpop.permute.xlu2 %2583 }
 0x2ed   :  { %v2586_v59 = vunpack.i.h.bf16 %v2584_v58  ;;  %v2585_v60 = vunpack.i.l.bf16 %v2584_v58 }
 0x2ef   :  { %v568_v61 = vsel %vm97_vm7, %v2586_v59, %v561_v54  ;;  %v571_v62 = vsel %vm97_vm7, %v2576_v52, %v2585_v60 }
 0x2f0   :  { %858 = vmatpush.msrb.mxu0 %v568_v61  ;;  %918 = vmatpush.msrb.mxu3 %v571_v62 }
 0x2f2   :  { %859 = vmatpush.msrb.mxu0 %v3056_v31  ;;  %919 = vmatpush.msrb.mxu3 %v3062_v34 }
 0x2f3   :  { %2396 = vmatmul.msk.f32.vlgmr.msrb.gmra.mxu0 %vm378_vm8, %v804_v57  ;;  %2399 = vmatmul.msk.f32.vlgmr.msrb.gmra.mxu3 %vm378_vm8, %v804_v57 }
 0x368   :  { %v3146_v63 = vpop.f32.mrf.mxu1 }
 0x369   :  { %v936_v5 = vmul.f32 %v928_v33, %v3146_v63 }
 0x36b   :  { %v945_v34 = vmul.f32 %v936_v5, %v3146_v63 }
 0x36e   :  { %v901_v8 = vpop.f32.mrf.mxu2 }
 0x36f   :  { %v937_v10 = vmul.f32 %v929_v7, %v901_v8 }
 0x370   :  { %v861_v9 = vpop.f32.mrf.mxu0 }
 0x371   :  { %v935_v31 = vmul.f32 %v927_v4, %v861_v9  ;;  %v946_v14 = vmul.f32 %v937_v10, %v901_v8 }
 0x373   :  { %v944_v11 = vmul.f32 %v935_v31, %v861_v9  ;;  %v939_v13 = vadd.f32 %v936_v5, %v935_v31 }
 0x375   :  { %v940_v15 = vadd.f32 %v939_v13, %v937_v10  ;;  %v948_v16 = vadd.f32 %v945_v34, %v944_v11 }
 0x376   :  { %v921_v17 = vpop.f32.mrf.mxu3 }
 0x377   :  { %v938_v18 = vmul.f32 %v930_v12, %v921_v17  ;;  %v949_v21 = vadd.f32 %v948_v16, %v946_v14 }
 0x379   :  { %v941_v19 = vadd.f32 %v940_v15, %v938_v18  ;;  %v947_v20 = vmul.f32 %v938_v18, %v921_v17 }
 0x37b   :  { %942 = vadd.xlane.f32.xlu2 %v941_v19  ;;  %v950_v22 = vadd.f32 %v949_v21, %v947_v20 }
 0x37d   :  { %951 = vadd.xlane.f32.xlu1 %v950_v22 }
 0x3ee   :  { %v943_v23 = vpop.xlane.xlu2 %942 }
 0x3ef   :  { %v953_v24 = vmul.f32 0.0034722222, %v943_v23 }
 0x3f0   :  { %v952_v25 = vpop.xlane.xlu1 %951 }
 0x3f1   :  { %v955_v26 = vmul.f32 %v953_v24, %v953_v24  ;;  %v954_v27 = vmul.f32 0.0034722222, %v952_v25 }
 0x3f3   :  { %v956_v28 = vsub.f32 %v954_v27, %v955_v26 }
 0x3f5   :  { %v958_v29 = vadd.f32 1e-05, %v956_v28 }
 0x3f7   :  { %2831 = vrsqrt.f32 %v958_v29  ;;  %vm965_vm13 = vweird.f32 %v958_v29 }
 0x3fd   :  { %v2832_v30 = vpop.eup %2831 }
 0x3fe   :  { %v960_v35 = vmul.f32 %v2832_v30, %v958_v29  ;;  %vm966_vm12 = vweird.f32 %v2832_v30 }
 0x3ff   :  { %vm967_vm14 = vmor %vm965_vm13, %vm966_vm12 }
 0x400   :  { %v961_v0 = vmul.f32 %v2832_v30, %v960_v35 }
 0x402   :  { %v962_v36 = vmul.f32 0.5, %v961_v0 }
 0x404   :  { %v963_v37 = vsub.f32 1.5, %v962_v36 }
 0x406   :  { %v964_v39 = vmul.f32 %v2832_v30, %v963_v37 }
 0x408   :  { %v968_v40 = vsel %vm967_vm14, %v2832_v30, %v964_v39 }
 0x409   :  { %v969_v41 = vmul.f32 %v968_v40, %v957_v38 }
 0x40b   :  { %975 = vperm.xlu0 %2587, %v969_v41   ;;  %v971_v3 = vmul.f32 %v969_v41, %v953_v24 }
 0x40d   :  { %v972_v6 = vsub.f32 %v970_v42, %v971_v3 }
 0x413   :  { %984 = vperm.xlu0 %2587, %v972_v6  }
 0x47d   :  { %v976_v43 = vpop.permute.xlu0 %975 }
 0x47e   :  { %v978_v1 = vmul.f32 %v976_v43, %v861_v9  ;;  %v980_v44 = vmul.f32 %v976_v43, %v901_v8  ;;  %v981_v45 = vmul.f32 %v976_v43, %v921_v17  ;;  %v979_v58 = vmul.f32 %v976_v43, %v3146_v63 }
 0x485   :  { %v985_v46 = vpop.permute.xlu0 %984 }
 0x486   :  { %v987_v47 = vadd.f32 %v985_v46, %v978_v1  ;;  %v989_v48 = vadd.f32 %v985_v46, %v980_v44  ;;  %v990_v49 = vadd.f32 %v985_v46, %v981_v45  ;;  %v988_v59 = vadd.f32 %v985_v46, %v979_v58 }
 0x488   :  { %v991_v50 = vmul.f32 0.2, %v987_v47  ;;  %v993_v51 = vmul.f32 0.2, %v989_v48  ;;  %v994_v52 = vmul.f32 0.2, %v990_v49 }
 0x48a   :  { %v3156_v53 = vmax.f32 %v987_v47, %v991_v50  ;;  %v3158_v54 = vmax.f32 %v989_v48, %v993_v51  ;;  %v3160_v55 = vmax.f32 %v990_v49, %v994_v52 }
 0x48c   :  { %v2598_v56 = vpack.i.bf16 %v3156_v53, %v2846_v2  ;;  %v2588_v57 = vpack.i.bf16 %v3160_v55, %v3158_v54  ;;  %v992_v2 = vmul.f32 0.2, %v988_v59 }
 0x48e   :  { %2599 = vrot.lane.b32.xlu2 %v2598_v56, %s2847_s30  ;;  %2589 = vrot.lane.b32.xlu0 %v2588_v57, %s2847_s30  ;;  %v3176_v60 = vmax.f32 %v988_v59, %v992_v2 }
 0x48f   :  { %2604 = vrot.lane.b32.xlu1 %v2588_v57, %s2849_s20 }
 0x496   :  { %2619 = vrot.lane.b32.xlu2 %v2598_v56, %s2849_s20  ;;  %2594 = vrot.lane.b32.xlu0 %v2588_v57, %s2848_s18 }
 0x497   :  { %2624 = vrot.lane.b32.xlu1 %v2588_v57, %s2851_s22 }
 0x49e   :  { %2629 = vrot.lane.b32.xlu2 %v2598_v56, %s2850_s21  ;;  %2609 = vrot.lane.b32.xlu0 %v2598_v56, %s2848_s18 }
 0x49f   :  { %2634 = vrot.lane.b32.xlu1 %v2588_v57, %s2852_s23 }
 0x4a6   :  { %2639 = vrot.lane.b32.xlu2 %v2598_v56, %s2851_s22  ;;  %1247 = vrot.lane.b32.xlu0 %v3176_v60, %s2847_s30 }
 0x4a7   :  { %2644 = vrot.lane.b32.xlu1 %v2588_v57, %s2853_s24 }
 0x4ae   :  { %2649 = vrot.lane.b32.xlu2 %v2598_v56, %s2852_s23  ;;  %2614 = vrot.lane.b32.xlu0 %v2588_v57, %s2850_s21 }
 0x4af   :  { %2654 = vrot.lane.b32.xlu1 %v2588_v57, %s2854_s25 }
 0x4b6   :  { %2659 = vrot.lane.b32.xlu2 %v2598_v56, %s2853_s24  ;;  %1215 = vrot.lane.b32.xlu0 %v3176_v60, %s2848_s18 }
 0x4b7   :  { %2664 = vrot.lane.b32.xlu1 %v2598_v56, %s2854_s25 }
 0x4be   :  { %1055 = vrot.lane.b32.xlu2 %v3176_v60, %s2853_s24  ;;  %1183 = vrot.lane.b32.xlu0 %v3176_v60, %s2849_s20 }
 0x4c6   :  { %1151 = vrot.lane.b32.xlu0 %v3176_v60, %s2850_s21 }
 0x4ce   :  { %1119 = vrot.lane.b32.xlu0 %v3176_v60, %s2851_s22 }
 0x4d6   :  { %1087 = vrot.lane.b32.xlu0 %v3176_v60, %s2852_s23 }
 0x4de   :  { %1023 = vrot.lane.b32.xlu0 %v3176_v60, %s2854_s25 }
 0x4e8   :  { %v2600_v61 = vpop.permute.xlu2 %2599 }
 0x4e9   :  { %v2601_v63 = vunpack.i.l.bf16 %v2600_v61  ;;  %v2602_v23 = vunpack.i.h.bf16 %v2600_v61 }
 0x4f0   :  { %v3201_v62 = vpop.permute.xlu2 %2619 }
 0x4f1   :  { %v2621_v20 = vunpack.i.l.bf16 %v3201_v62 }
 0x4f8   :  { %v3207_v9 = vpop.permute.xlu2 %2629 }
 0x4f9   :  { %v2631_v29 = vunpack.i.l.bf16 %v3207_v9 }
 0x500   :  { %v2590_v32 = vpop.permute.xlu0 %2589  ;;  %v3223_v18 = vpop.permute.xlu2 %2639 }
 0x501   :  { %v3203_v33 = vpop.permute.xlu1 %2604  ;;  %v2592_v4 = vunpack.i.h.bf16 %v2590_v32  ;;  %v2591_v5 = vunpack.i.l.bf16 %v2590_v32  ;;  %v2641_v39 = vunpack.i.l.bf16 %v3223_v18 }
 0x502   :  { %v2607_v10 = vunpack.i.h.bf16 %v3203_v33  ;;  %v2606_v11 = vunpack.i.l.bf16 %v3203_v33 }
 0x503   :  { %v1257_v7 = vsel %vm328_vm0, %v2591_v5, %v2592_v4  ;;  %v1258_v8 = vsel %vm328_vm0, %v2592_v4, %v2601_v63 }
 0x504   :  { %1354 = vmatpush.msra.mxu2 %v1257_v7  ;;  %1374 = vmatpush.msra.mxu3 %v1258_v8  ;;  %v1193_v15 = vsel %vm262_vm2, %v2606_v11, %v2607_v10  ;;  %v1194_v22 = vsel %vm262_vm2, %v2607_v10, %v2621_v20  ;;  %v2622_v7 = vunpack.i.h.bf16 %v3201_v62 }
 0x508   :  { %v3209_v31 = vpop.permute.xlu0 %2594  ;;  %v3232_v28 = vpop.permute.xlu2 %2649 }
 0x509   :  { %v3211_v34 = vpop.permute.xlu1 %2624  ;;  %v2597_v12 = vunpack.i.h.bf16 %v3209_v31  ;;  %v2596_v13 = vunpack.i.l.bf16 %v3209_v31  ;;  %v2651_v6 = vunpack.i.l.bf16 %v3232_v28 }
 0x50a   :  { %v2627_v0 = vunpack.i.h.bf16 %v3211_v34  ;;  %v2626_v36 = vunpack.i.l.bf16 %v3211_v34 }
 0x50b   :  { %v1225_v14 = vsel %vm295_vm1, %v2596_v13, %v2597_v12 }
 0x50c   :  { %1355 = vmatpush.msra.mxu2 %v1225_v14  ;;  %v1129_v1 = vsel %vm196_vm4, %v2626_v36, %v2627_v0  ;;  %v1130_v44 = vsel %vm196_vm4, %v2627_v0, %v2641_v39 }
 0x50e   :  { %1356 = vmatpush.msra.mxu2 %v1193_v15 }
 0x510   :  { %v2610_v17 = vpop.permute.xlu0 %2609  ;;  %v3245_v43 = vpop.permute.xlu2 %2659 }
 0x511   :  { %v3221_v16 = vpop.permute.xlu1 %2634  ;;  %v2611_v19 = vunpack.i.l.bf16 %v2610_v17  ;;  %v2612_v47 = vunpack.i.h.bf16 %v2610_v17  ;;  %v2661_v50 = vunpack.i.l.bf16 %v3245_v43 }
 0x512   :  { %v2637_v40 = vunpack.i.h.bf16 %v3221_v16  ;;  %v2636_v41 = vunpack.i.l.bf16 %v3221_v16  ;;  %v2405_v16 = vld [vmem:[%s3567_s2 + $0x2] ss:$4 sm:$0xf] }
 0x513   :  { %v1226_v21 = vsel %vm295_vm1, %v2597_v12, %v2611_v19  ;;  %v2632_v12 = vunpack.i.h.bf16 %v3207_v9  ;;  %v2652_v9 = vunpack.i.h.bf16 %v3232_v28  ;;  %v2662_v19 = vunpack.i.h.bf16 %v3245_v43 }
 0x514   :  { %1375 = vmatpush.msra.mxu3 %v1226_v21  ;;  %v1097_v48 = vsel %vm163_vm5, %v2636_v41, %v2637_v40  ;;  %v1098_v49 = vsel %vm163_vm5, %v2637_v40, %v2651_v6  ;;  %v1392_v28 = vperm.slane %v2405_v16, 2 }
 0x516   :  { %1376 = vmatpush.msra.mxu3 %v1194_v22 }
 0x518   :  { %v1248_v25 = vpop.permute.xlu0 %1247 }
 0x519   :  { %v3228_v24 = vpop.permute.xlu1 %2644  ;;  %v1255_v26 = vsel %vm328_vm0, %v2602_v23, %v1248_v25  ;;  %v1256_v27 = vsel %vm328_vm0, %v1248_v25, %v2591_v5  ;;  %v1267_v5 = vld [vmem:[%s3573_s9] sm:$0xff] }
 0x51a   :  { %1314 = vmatpush.msra.mxu0 %v1255_v26  ;;  %1334 = vmatpush.msra.mxu1 %v1256_v27  ;;  %v2647_v45 = vunpack.i.h.bf16 %v3228_v24  ;;  %v2646_v46 = vunpack.i.l.bf16 %v3228_v24  ;;  %v1390_v26 = vperm.slane %v2405_v16, 0  ;;  %v1391_v27 = vperm.slane %v2405_v16, 1 }
 0x51c   :  { %v1065_v61 = vsel %vm130_vm6, %v2646_v46, %v2647_v45  ;;  %v1066_v32 = vsel %vm130_vm6, %v2647_v45, %v2661_v50 }
 0x520   :  { %v2615_v35 = vpop.permute.xlu0 %2614 }
 0x521   :  { %v3235_v30 = vpop.permute.xlu1 %2654  ;;  %v2617_v37 = vunpack.i.h.bf16 %v2615_v35  ;;  %v2616_v38 = vunpack.i.l.bf16 %v2615_v35  ;;  %v1393_v35 = vperm.slane %v2405_v16, 3 }
 0x522   :  { %v2657_v51 = vunpack.i.h.bf16 %v3235_v30  ;;  %v2656_v52 = vunpack.i.l.bf16 %v3235_v30 }
 0x523   :  { %v1161_v3 = vsel %vm229_vm3, %v2616_v38, %v2617_v37  ;;  %v1162_v42 = vsel %vm229_vm3, %v2617_v37, %v2631_v29 }
 0x524   :  { %1357 = vmatpush.msra.mxu2 %v1161_v3  ;;  %1377 = vmatpush.msra.mxu3 %v1162_v42  ;;  %v1033_v4 = vsel %vm97_vm7, %v2656_v52, %v2657_v51 }
 0x526   :  { %1358 = vmatpush.msra.mxu2 %v1129_v1  ;;  %1378 = vmatpush.msra.mxu3 %v1130_v44 }
 0x528   :  { %v1216_v56 = vpop.permute.xlu0 %1215  ;;  %1359 = vmatpush.msra.mxu2 %v1097_v48  ;;  %1379 = vmatpush.msra.mxu3 %v1098_v49 }
 0x529   :  { %v2665_v57 = vpop.permute.xlu1 %2664  ;;  %v1223_v59 = vsel %vm295_vm1, %v2612_v47, %v1216_v56  ;;  %v1224_v2 = vsel %vm295_vm1, %v1216_v56, %v2596_v13  ;;  %v2642_v13 = vunpack.i.h.bf16 %v3223_v18 }
 0x52a   :  { %v2666_v58 = vunpack.i.l.bf16 %v2665_v57  ;;  %1315 = vmatpush.msra.mxu0 %v1223_v59  ;;  %1335 = vmatpush.msra.mxu1 %v1224_v2  ;;  %v2667_v22 = vunpack.i.h.bf16 %v2665_v57 }
 0x52b   :  { %1360 = vmatpush.msra.mxu2 %v1065_v61  ;;  %1380 = vmatpush.msra.mxu3 %v1066_v32  ;;  %v1420_v61 = vld [vmem:[%s3574_s10] sm:$0xff] }
 0x52c   :  { %v1034_v63 = vsel %vm97_vm7, %v2657_v51, %v2666_v58 }
 0x52d   :  { %1361 = vmatpush.msra.mxu2 %v1033_v4  ;;  %1381 = vmatpush.msra.mxu3 %v1034_v63 }
 0x52f   :  { %1362 = vmatpush.msra.mxu2 %v3158_v54  ;;  %1382 = vmatpush.msra.mxu3 %v3160_v55 }
 0x530   :  { %v1184_v8 = vpop.permute.xlu0 %1183  ;;  %2403 = vmatmul.msk.f32.vlgmr.msra.gmra.mxu2 %vm378_vm8, %v1267_v5  ;;  %2404 = vmatmul.msk.f32.vlgmr.msra.gmra.mxu3 %vm378_vm8, %v1267_v5 }
 0x531   :  { %v1191_v31 = vsel %vm262_vm2, %v2622_v7, %v1184_v8  ;;  %v1192_v10 = vsel %vm262_vm2, %v1184_v8, %v2606_v11  ;;  %v1056_v11 = vpop.permute.xlu2 %1055  ;;  %v1433_v7 = vld [vmem:[%s3575_s11] sm:$0xff] }
 0x532   :  { %1316 = vmatpush.msra.mxu0 %v1191_v31  ;;  %1336 = vmatpush.msra.mxu1 %v1192_v10  ;;  %v1063_v34 = vsel %vm130_vm6, %v2662_v19, %v1056_v11  ;;  %v1064_v21 = vsel %vm130_vm6, %v1056_v11, %v2646_v46 }
 0x538   :  { %v1152_v62 = vpop.permute.xlu0 %1151 }
 0x539   :  { %v1159_v54 = vsel %vm229_vm3, %v2632_v12, %v1152_v62  ;;  %v1160_v55 = vsel %vm229_vm3, %v1152_v62, %v2616_v38 }
 0x53a   :  { %1317 = vmatpush.msra.mxu0 %v1159_v54  ;;  %1337 = vmatpush.msra.mxu1 %v1160_v55 }
 0x540   :  { %v1120_v14 = vpop.permute.xlu0 %1119 }
 0x541   :  { %v1127_v15 = vsel %vm196_vm4, %v2642_v13, %v1120_v14  ;;  %v1128_v33 = vsel %vm196_vm4, %v1120_v14, %v2626_v36 }
 0x542   :  { %1318 = vmatpush.msra.mxu0 %v1127_v15  ;;  %1338 = vmatpush.msra.mxu1 %v1128_v33 }
 0x548   :  { %v1088_v17 = vpop.permute.xlu0 %1087 }
 0x549   :  { %v1095_v20 = vsel %vm163_vm5, %v2652_v9, %v1088_v17  ;;  %v1096_v18 = vsel %vm163_vm5, %v1088_v17, %v2636_v41 }
 0x54a   :  { %1319 = vmatpush.msra.mxu0 %v1095_v20  ;;  %1339 = vmatpush.msra.mxu1 %v1096_v18  ;;  %v3315_v18 = vld [vmem:[#allocation2 + $0x18] sm:$0xff] }
 0x54c   :  { %1320 = vmatpush.msra.mxu0 %v1063_v34  ;;  %1340 = vmatpush.msra.mxu1 %v1064_v21 }
 0x550   :  { %v1024_v23 = vpop.permute.xlu0 %1023 }
 0x551   :  { %v1031_v24 = vsel %vm97_vm7, %v2667_v22, %v1024_v23  ;;  %v1032_v25 = vsel %vm97_vm7, %v1024_v23, %v2656_v52 }
 0x552   :  { %1321 = vmatpush.msra.mxu0 %v1031_v24  ;;  %1341 = vmatpush.msra.mxu1 %v1032_v25 }
 0x554   :  { %1322 = vmatpush.msra.mxu0 %v3156_v53  ;;  %1342 = vmatpush.msra.mxu1 %v3176_v60 }
 0x555   :  { %2401 = vmatmul.msk.f32.vlgmr.msra.gmra.mxu0 %vm378_vm8, %v1267_v5  ;;  %2402 = vmatmul.msk.f32.vlgmr.msra.gmra.mxu1 %vm378_vm8, %v1267_v5 }
 0x5b3   :  { %v1364_v29 = vpop.f32.mrf.mxu2  ;;  %v1384_v30 = vpop.f32.mrf.mxu3 }
 0x5b4   :  { %v1400_v38 = vmul.f32 %v1392_v28, %v1364_v29  ;;  %v1401_v40 = vmul.f32 %v1393_v35, %v1384_v30 }
 0x5b6   :  { %v1409_v3 = vmul.f32 %v1400_v38, %v1364_v29  ;;  %v1410_v1 = vmul.f32 %v1401_v40, %v1384_v30 }
 0x5d2   :  { %v1324_v0 = vpop.f32.mrf.mxu0  ;;  %v1344_v36 = vpop.f32.mrf.mxu1 }
 0x5d3   :  { %v1398_v37 = vmul.f32 %v1390_v26, %v1324_v0  ;;  %v1399_v53 = vmul.f32 %v1391_v27, %v1344_v36 }
 0x5d5   :  { %v1407_v60 = vmul.f32 %v1398_v37, %v1324_v0  ;;  %v1408_v39 = vmul.f32 %v1399_v53, %v1344_v36  ;;  %v1402_v41 = vadd.f32 %v1399_v53, %v1398_v37 }
 0x5d7   :  { %v1403_v42 = vadd.f32 %v1402_v41, %v1400_v38  ;;  %v1411_v6 = vadd.f32 %v1408_v39, %v1407_v60 }
 0x5d9   :  { %v1404_v43 = vadd.f32 %v1403_v42, %v1401_v40  ;;  %v1412_v44 = vadd.f32 %v1411_v6, %v1409_v3 }
 0x5db   :  { %1405 = vadd.xlane.f32.xlu1 %v1404_v43  ;;  %v1413_v45 = vadd.f32 %v1412_v44, %v1410_v1 }
 0x5dd   :  { %1414 = vadd.xlane.f32.xlu2 %v1413_v45 }
 0x64e   :  { %v1406_v46 = vpop.xlane.xlu1 %1405 }
 0x64f   :  { %v1416_v47 = vmul.f32 0.005, %v1406_v46 }
 0x650   :  { %v1415_v48 = vpop.xlane.xlu2 %1414 }
 0x651   :  { %v1418_v49 = vmul.f32 %v1416_v47, %v1416_v47  ;;  %v1417_v50 = vmul.f32 0.005, %v1415_v48 }
 0x653   :  { %v1419_v51 = vsub.f32 %v1417_v50, %v1418_v49 }
 0x655   :  { %v1421_v52 = vadd.f32 1e-05, %v1419_v51 }
 0x657   :  { %2833 = vrsqrt.f32 %v1421_v52  ;;  %vm1428_vm9 = vweird.f32 %v1421_v52 }
 0x65d   :  { %v2834_v56 = vpop.eup %2833 }
 0x65e   :  { %v1423_v57 = vmul.f32 %v2834_v56, %v1421_v52  ;;  %vm1429_vm15 = vweird.f32 %v2834_v56 }
 0x65f   :  { %vm1430_vm10 = vmor %vm1428_vm9, %vm1429_vm15 }
 0x660   :  { %v1424_v58 = vmul.f32 %v2834_v56, %v1423_v57 }
 0x662   :  { %v1425_v59 = vmul.f32 0.5, %v1424_v58 }
 0x664   :  { %v1426_v2 = vsub.f32 1.5, %v1425_v59 }
 0x666   :  { %v1427_v32 = vmul.f32 %v2834_v56, %v1426_v2 }
 0x668   :  { %v1431_v63 = vsel %vm1430_vm10, %v2834_v56, %v1427_v32 }
 0x669   :  { %v1432_v4 = vmul.f32 %v1431_v63, %v1420_v61 }
 0x66b   :  { %1438 = vperm.xlu0 %2587, %v1432_v4   ;;  %v1434_v5 = vmul.f32 %v1432_v4, %v1416_v47 }
 0x66d   :  { %v1435_v8 = vsub.f32 %v1433_v7, %v1434_v5 }
 0x673   :  { %1447 = vperm.xlu0 %2587, %v1435_v8  }
 0x6dd   :  { %v1439_v31 = vpop.permute.xlu0 %1438 }
 0x6de   :  { %v1441_v10 = vmul.f32 %v1439_v31, %v1324_v0  ;;  %v1443_v12 = vmul.f32 %v1439_v31, %v1364_v29  ;;  %v1444_v62 = vmul.f32 %v1439_v31, %v1384_v30  ;;  %v1442_v19 = vmul.f32 %v1439_v31, %v1344_v36 }
 0x6e5   :  { %v1448_v54 = vpop.permute.xlu0 %1447 }
 0x6e6   :  { %v1450_v55 = vadd.f32 %v1448_v54, %v1441_v10  ;;  %v1452_v13 = vadd.f32 %v1448_v54, %v1443_v12  ;;  %v1453_v14 = vadd.f32 %v1448_v54, %v1444_v62  ;;  %v1451_v21 = vadd.f32 %v1448_v54, %v1442_v19 }
 0x6e8   :  { %v1454_v15 = vmul.f32 0.2, %v1450_v55  ;;  %v1456_v33 = vmul.f32 0.2, %v1452_v13  ;;  %v1457_v9 = vmul.f32 0.2, %v1453_v14 }
 0x6e9   :  { %v1455_v23 = vmul.f32 0.2, %v1451_v21 }
 0x6ea   :  { %v3309_v11 = vmax.f32 %v1450_v55, %v1454_v15  ;;  %v3311_v17 = vmax.f32 %v1452_v13, %v1456_v33  ;;  %v3313_v20 = vmax.f32 %v1453_v14, %v1457_v9 }
 0x6eb   :  { %v3324_v24 = vmax.f32 %v1451_v21, %v1455_v23 }
 0x6ec   :  { %v2688_v34 = vpack.i.bf16 %v3309_v11, %v3315_v18  ;;  %v2668_v22 = vpack.i.bf16 %v3313_v20, %v3311_v17 }
 0x6ee   :  { %2689 = vrot.lane.b32.xlu2 %v2688_v34, %s2848_s18  ;;  %2669 = vrot.lane.b32.xlu0 %v2668_v22, %s2847_s30 }
 0x6ef   :  { %2684 = vrot.lane.b32.xlu1 %v2668_v22, %s2849_s20 }
 0x6f6   :  { %2704 = vrot.lane.b32.xlu2 %v2668_v22, %s2851_s22  ;;  %2674 = vrot.lane.b32.xlu0 %v2668_v22, %s2848_s18 }
 0x6f7   :  { %1678 = vrot.lane.b32.xlu1 %v3324_v24, %s2848_s18 }
 0x6fe   :  { %2714 = vrot.lane.b32.xlu2 %v2668_v22, %s2852_s23  ;;  %2679 = vrot.lane.b32.xlu0 %v2688_v34, %s2847_s30 }
 0x6ff   :  { %1646 = vrot.lane.b32.xlu1 %v3324_v24, %s2849_s20 }
 0x706   :  { %2724 = vrot.lane.b32.xlu2 %v2668_v22, %s2853_s24  ;;  %1710 = vrot.lane.b32.xlu0 %v3324_v24, %s2847_s30 }
 0x707   :  { %1614 = vrot.lane.b32.xlu1 %v3324_v24, %s2850_s21 }
 0x70e   :  { %2734 = vrot.lane.b32.xlu2 %v2668_v22, %s2854_s25  ;;  %2694 = vrot.lane.b32.xlu0 %v2668_v22, %s2850_s21 }
 0x70f   :  { %1582 = vrot.lane.b32.xlu1 %v3324_v24, %s2851_s22 }
 0x716   :  { %2744 = vrot.lane.b32.xlu2 %v2688_v34, %s2854_s25  ;;  %2699 = vrot.lane.b32.xlu0 %v2688_v34, %s2849_s20 }
 0x717   :  { %1550 = vrot.lane.b32.xlu1 %v3324_v24, %s2852_s23 }
 0x71e   :  { %2709 = vrot.lane.b32.xlu0 %v2688_v34, %s2850_s21 }
 0x71f   :  { %1486 = vrot.lane.b32.xlu1 %v3324_v24, %s2854_s25 }
 0x726   :  { %2719 = vrot.lane.b32.xlu0 %v2688_v34, %s2851_s22 }
 0x72e   :  { %2729 = vrot.lane.b32.xlu0 %v2688_v34, %s2852_s23 }
 0x736   :  { %2739 = vrot.lane.b32.xlu0 %v2688_v34, %s2853_s24 }
 0x73e   :  { %1518 = vrot.lane.b32.xlu0 %v3324_v24, %s2853_s24 }
 0x748   :  { %v2690_v25 = vpop.permute.xlu2 %2689 }
 0x749   :  { %v2691_v6 = vunpack.i.l.bf16 %v2690_v25  ;;  %v2692_v47 = vunpack.i.h.bf16 %v2690_v25 }
 0x750   :  { %v3358_v30 = vpop.permute.xlu2 %2704 }
 0x751   :  { %v2707_v59 = vunpack.i.h.bf16 %v3358_v30  ;;  %v2706_v2 = vunpack.i.l.bf16 %v3358_v30 }
 0x753   :  { %v1592_v62 = vsel %vm196_vm4, %v2706_v2, %v2707_v59 }
 0x758   :  { %v3366_v40 = vpop.permute.xlu2 %2714 }
 0x759   :  { %v2717_v63 = vunpack.i.h.bf16 %v3366_v40  ;;  %v2716_v4 = vunpack.i.l.bf16 %v3366_v40 }
 0x75b   :  { %v1560_v13 = vsel %vm163_vm5, %v2716_v4, %v2717_v63 }
 0x760   :  { %v2670_v16 = vpop.permute.xlu0 %2669  ;;  %v3372_v50 = vpop.permute.xlu2 %2724 }
 0x761   :  { %v3355_v26 = vpop.permute.xlu1 %2684  ;;  %v2672_v27 = vunpack.i.h.bf16 %v2670_v16  ;;  %v2671_v28 = vunpack.i.l.bf16 %v2670_v16  ;;  %v2727_v31 = vunpack.i.h.bf16 %v3372_v50  ;;  %v2726_v10 = vunpack.i.l.bf16 %v3372_v50  ;;  %v1730_v16 = vld [vmem:[%s3576_s12] sm:$0xff] }
 0x762   :  { %v2687_v36 = vunpack.i.h.bf16 %v3355_v26  ;;  %v2686_v37 = vunpack.i.l.bf16 %v3355_v26 }
 0x763   :  { %v1720_v29 = vsel %vm328_vm0, %v2671_v28, %v2672_v27  ;;  %v1528_v34 = vsel %vm130_vm6, %v2726_v10, %v2727_v31 }
 0x764   :  { %1817 = vmatpush.msrb.mxu2 %v1720_v29  ;;  %v1656_v39 = vsel %vm262_vm2, %v2686_v37, %v2687_v36 }
 0x768   :  { %v2675_v35 = vpop.permute.xlu0 %2674  ;;  %v3383_v8 = vpop.permute.xlu2 %2734 }
 0x769   :  { %v1679_v0 = vpop.permute.xlu1 %1678  ;;  %v2677_v53 = vunpack.i.h.bf16 %v2675_v35  ;;  %v2676_v38 = vunpack.i.l.bf16 %v2675_v35  ;;  %v2737_v54 = vunpack.i.h.bf16 %v3383_v8  ;;  %v2736_v55 = vunpack.i.l.bf16 %v3383_v8 }
 0x76a   :  { %v1686_v51 = vsel %vm295_vm1, %v2692_v47, %v1679_v0 }
 0x76b   :  { %v1688_v60 = vsel %vm295_vm1, %v2676_v38, %v2677_v53  ;;  %v1689_v1 = vsel %vm295_vm1, %v2677_v53, %v2691_v6  ;;  %v1687_v52 = vsel %vm295_vm1, %v1679_v0, %v2676_v38  ;;  %v1496_v22 = vsel %vm97_vm7, %v2736_v55, %v2737_v54 }
 0x76c   :  { %1818 = vmatpush.msrb.mxu2 %v1688_v60 }
 0x76e   :  { %1819 = vmatpush.msrb.mxu2 %v1656_v39 }
 0x770   :  { %v2680_v3 = vpop.permute.xlu0 %2679  ;;  %v2745_v40 = vpop.permute.xlu2 %2744 }
 0x771   :  { %v1647_v41 = vpop.permute.xlu1 %1646  ;;  %v2681_v42 = vunpack.i.l.bf16 %v2680_v3  ;;  %v2682_v44 = vunpack.i.h.bf16 %v2680_v3  ;;  %v2746_v3 = vunpack.i.l.bf16 %v2745_v40 }
 0x772   :  { %v1655_v56 = vsel %vm262_vm2, %v1647_v41, %v2686_v37 }
 0x773   :  { %v1721_v43 = vsel %vm328_vm0, %v2672_v27, %v2681_v42 }
 0x774   :  { %1837 = vmatpush.msrb.mxu3 %v1721_v43  ;;  %v1497_v43 = vsel %vm97_vm7, %v2737_v54, %v2746_v3 }
 0x776   :  { %1838 = vmatpush.msrb.mxu3 %v1689_v1 }
 0x778   :  { %v1711_v46 = vpop.permute.xlu0 %1710 }
 0x779   :  { %v1615_v45 = vpop.permute.xlu1 %1614  ;;  %v1718_v48 = vsel %vm328_vm0, %v2682_v44, %v1711_v46  ;;  %v1719_v49 = vsel %vm328_vm0, %v1711_v46, %v2671_v28  ;;  %v2747_v46 = vunpack.i.h.bf16 %v2745_v40 }
 0x77a   :  { %1777 = vmatpush.msrb.mxu0 %v1718_v48  ;;  %1797 = vmatpush.msrb.mxu1 %v1719_v49 }
 0x77c   :  { %1778 = vmatpush.msrb.mxu0 %v1686_v51  ;;  %1798 = vmatpush.msrb.mxu1 %v1687_v52 }
 0x77e   :  { %1799 = vmatpush.msrb.mxu1 %v1655_v56 }
 0x780   :  { %v2695_v58 = vpop.permute.xlu0 %2694 }
 0x781   :  { %v1583_v57 = vpop.permute.xlu1 %1582  ;;  %v2697_v61 = vunpack.i.h.bf16 %v2695_v58  ;;  %v2696_v32 = vunpack.i.l.bf16 %v2695_v58 }
 0x782   :  { %v1591_v12 = vsel %vm196_vm4, %v1583_v57, %v2706_v2 }
 0x783   :  { %v1623_v5 = vsel %vm229_vm3, %v1615_v45, %v2696_v32  ;;  %v1624_v7 = vsel %vm229_vm3, %v2696_v32, %v2697_v61 }
 0x784   :  { %1800 = vmatpush.msrb.mxu1 %v1623_v5  ;;  %1820 = vmatpush.msrb.mxu2 %v1624_v7 }
 0x786   :  { %1801 = vmatpush.msrb.mxu1 %v1591_v12  ;;  %1821 = vmatpush.msrb.mxu2 %v1592_v62 }
 0x788   :  { %1822 = vmatpush.msrb.mxu2 %v1560_v13  ;;  %v2700_v15 = vpop.permute.xlu0 %2699 }
 0x789   :  { %v1551_v14 = vpop.permute.xlu1 %1550  ;;  %v2702_v33 = vunpack.i.h.bf16 %v2700_v15  ;;  %v2701_v9 = vunpack.i.l.bf16 %v2700_v15 }
 0x78a   :  { %v1559_v19 = vsel %vm163_vm5, %v1551_v14, %v2716_v4  ;;  %1823 = vmatpush.msrb.mxu2 %v1528_v34 }
 0x78b   :  { %1802 = vmatpush.msrb.mxu1 %v1559_v19  ;;  %v1654_v21 = vsel %vm262_vm2, %v2702_v33, %v1647_v41  ;;  %v1657_v23 = vsel %vm262_vm2, %v2687_v36, %v2701_v9 }
 0x78c   :  { %1779 = vmatpush.msrb.mxu0 %v1654_v21  ;;  %1824 = vmatpush.msrb.mxu2 %v1496_v22 }
 0x78d   :  { %1839 = vmatpush.msrb.mxu3 %v1657_v23 }
 0x78e   :  { %1825 = vmatpush.msrb.mxu2 %v3311_v17 }
 0x78f   :  { %2408 = vmatmul.msk.f32.vlgmr.msrb.gmra.mxu2 %vm378_vm8, %v1730_v16 }
 0x790   :  { %v2710_v25 = vpop.permute.xlu0 %2709 }
 0x791   :  { %v2712_v27 = vunpack.i.h.bf16 %v2710_v25  ;;  %v2711_v28 = vunpack.i.l.bf16 %v2710_v25  ;;  %v1487_v44 = vpop.permute.xlu1 %1486 }
 0x792   :  { %v1494_v49 = vsel %vm97_vm7, %v2747_v46, %v1487_v44  ;;  %v1495_v51 = vsel %vm97_vm7, %v1487_v44, %v2736_v55 }
 0x793   :  { %v1622_v29 = vsel %vm229_vm3, %v2712_v27, %v1615_v45  ;;  %v1625_v26 = vsel %vm229_vm3, %v2697_v61, %v2711_v28  ;;  %v1883_v27 = vld [vmem:[%s3577_s13] sm:$0xff] }
 0x794   :  { %1780 = vmatpush.msrb.mxu0 %v1622_v29  ;;  %1840 = vmatpush.msrb.mxu3 %v1625_v26 }
 0x798   :  { %v2720_v30 = vpop.permute.xlu0 %2719 }
 0x799   :  { %v2722_v35 = vunpack.i.h.bf16 %v2720_v30  ;;  %v2721_v0 = vunpack.i.l.bf16 %v2720_v30 }
 0x79b   :  { %v1590_v17 = vsel %vm196_vm4, %v2722_v35, %v1583_v57  ;;  %v1593_v36 = vsel %vm196_vm4, %v2707_v59, %v2721_v0  ;;  %v1896_v35 = vld [vmem:[%s3578_s14] sm:$0xff] }
 0x79c   :  { %1781 = vmatpush.msrb.mxu0 %v1590_v17  ;;  %1841 = vmatpush.msrb.mxu3 %v1593_v36 }
 0x7a0   :  { %v2730_v37 = vpop.permute.xlu0 %2729 }
 0x7a1   :  { %v2732_v53 = vunpack.i.h.bf16 %v2730_v37  ;;  %v2731_v38 = vunpack.i.l.bf16 %v2730_v37 }
 0x7a3   :  { %v1558_v60 = vsel %vm163_vm5, %v2732_v53, %v1551_v14  ;;  %v1561_v39 = vsel %vm163_vm5, %v2717_v63, %v2731_v38 }
 0x7a4   :  { %1782 = vmatpush.msrb.mxu0 %v1558_v60  ;;  %1842 = vmatpush.msrb.mxu3 %v1561_v39 }
 0x7a8   :  { %v2740_v41 = vpop.permute.xlu0 %2739 }
 0x7a9   :  { %v2741_v42 = vunpack.i.l.bf16 %v2740_v41  ;;  %v2742_v1 = vunpack.i.h.bf16 %v2740_v41 }
 0x7ab   :  { %v1529_v6 = vsel %vm130_vm6, %v2727_v31, %v2741_v42 }
 0x7ac   :  { %1843 = vmatpush.msrb.mxu3 %v1529_v6 }
 0x7ae   :  { %1844 = vmatpush.msrb.mxu3 %v1497_v43 }
 0x7b0   :  { %v1519_v45 = vpop.permute.xlu0 %1518  ;;  %1845 = vmatpush.msrb.mxu3 %v3313_v20  ;;  %v2410_v20 = vld [vmem:[%s3567_s2 + $0x3] ss:$4 sm:$0xf] }
 0x7b1   :  { %v1526_v47 = vsel %vm130_vm6, %v2742_v1, %v1519_v45  ;;  %v1527_v48 = vsel %vm130_vm6, %v1519_v45, %v2726_v10  ;;  %2409 = vmatmul.msk.f32.vlgmr.msrb.gmra.mxu3 %vm378_vm8, %v1730_v16  ;;  %v1853_v50 = vperm.slane %v2410_v20, 0  ;;  %v1854_v52 = vperm.slane %v2410_v20, 1 }
 0x7b2   :  { %1783 = vmatpush.msrb.mxu0 %v1526_v47  ;;  %1803 = vmatpush.msrb.mxu1 %v1527_v48  ;;  %v1855_v56 = vperm.slane %v2410_v20, 2  ;;  %v1856_v58 = vperm.slane %v2410_v20, 3 }
 0x7b4   :  { %1784 = vmatpush.msrb.mxu0 %v1494_v49  ;;  %1804 = vmatpush.msrb.mxu1 %v1495_v51 }
 0x7b6   :  { %1785 = vmatpush.msrb.mxu0 %v3309_v11  ;;  %1805 = vmatpush.msrb.mxu1 %v3324_v24 }
 0x7b7   :  { %2406 = vmatmul.msk.f32.vlgmr.msrb.gmra.mxu0 %vm378_vm8, %v1730_v16  ;;  %2407 = vmatmul.msk.f32.vlgmr.msrb.gmra.mxu1 %vm378_vm8, %v1730_v16 }
 0x812   :  { %v1827_v57 = vpop.f32.mrf.mxu2 }
 0x813   :  { %v1863_v11 = vmul.f32 %v1855_v56, %v1827_v57 }
 0x815   :  { %v1872_v8 = vmul.f32 %v1863_v11, %v1827_v57 }
 0x834   :  { %v1787_v59 = vpop.f32.mrf.mxu0  ;;  %v1807_v2 = vpop.f32.mrf.mxu1 }
 0x835   :  { %v1861_v61 = vmul.f32 %v1853_v50, %v1787_v59  ;;  %v1862_v32 = vmul.f32 %v1854_v52, %v1807_v2  ;;  %v1847_v63 = vpop.f32.mrf.mxu3 }
 0x836   :  { %v1864_v5 = vmul.f32 %v1856_v58, %v1847_v63 }
 0x837   :  { %v1870_v24 = vmul.f32 %v1861_v61, %v1787_v59  ;;  %v1871_v4 = vmul.f32 %v1862_v32, %v1807_v2  ;;  %v1865_v7 = vadd.f32 %v1862_v32, %v1861_v61 }
 0x838   :  { %v1873_v62 = vmul.f32 %v1864_v5, %v1847_v63 }
 0x839   :  { %v1866_v31 = vadd.f32 %v1865_v7, %v1863_v11  ;;  %v1874_v10 = vadd.f32 %v1871_v4, %v1870_v24 }
 0x83b   :  { %v1867_v12 = vadd.f32 %v1866_v31, %v1864_v5  ;;  %v1875_v54 = vadd.f32 %v1874_v10, %v1872_v8 }
 0x83d   :  { %1868 = vadd.xlane.f32.xlu2 %v1867_v12  ;;  %v1876_v55 = vadd.f32 %v1875_v54, %v1873_v62 }
 0x83f   :  { %1877 = vadd.xlane.f32.xlu0 %v1876_v55 }
 0x8b0   :  { %v1869_v13 = vpop.xlane.xlu2 %1868 }
 0x8b1   :  { %v1879_v14 = vmul.f32 0.0078125, %v1869_v13 }
 0x8b2   :  { %v1878_v15 = vpop.xlane.xlu0 %1877 }
 0x8b3   :  { %v1881_v33 = vmul.f32 %v1879_v14, %v1879_v14  ;;  %v1880_v9 = vmul.f32 0.0078125, %v1878_v15 }
 0x8b5   :  { %v1882_v19 = vsub.f32 %v1880_v9, %v1881_v33 }
 0x8b7   :  { %v1884_v34 = vadd.f32 1e-05, %v1882_v19 }
 0x8b9   :  { %2835 = vrsqrt.f32 %v1884_v34  ;;  %vm1891_vm12 = vweird.f32 %v1884_v34 }
 0x8bf   :  { %v2836_v21 = vpop.eup %2835 }
 0x8c0   :  { %v1886_v22 = vmul.f32 %v2836_v21, %v1884_v34  ;;  %vm1892_vm11 = vweird.f32 %v2836_v21 }
 0x8c1   :  { %vm1893_vm13 = vmor %vm1891_vm12, %vm1892_vm11 }
 0x8c2   :  { %v1887_v23 = vmul.f32 %v2836_v21, %v1886_v22 }
 0x8c4   :  { %v1888_v25 = vmul.f32 0.5, %v1887_v23 }
 0x8c6   :  { %v1889_v16 = vsub.f32 1.5, %v1888_v25 }
 0x8c8   :  { %v1890_v28 = vmul.f32 %v2836_v21, %v1889_v16 }
 0x8ca   :  { %v1894_v29 = vsel %vm1893_vm13, %v2836_v21, %v1890_v28 }
 0x8cb   :  { %v1895_v26 = vmul.f32 %v1894_v29, %v1883_v27 }
 0x8cd   :  { %1901 = vperm.xlu1 %2748, %v1895_v26   ;;  %v1897_v30 = vmul.f32 %v1895_v26, %v1879_v14 }
 0x8cf   :  { %v1898_v0 = vsub.f32 %v1896_v35, %v1897_v30 }
 0x8d5   :  { %1910 = vperm.xlu1 %2748, %v1898_v0  }
 0x93f   :  { %v1902_v17 = vpop.permute.xlu1 %1901 }
 0x940   :  { %v1904_v36 = vmul.f32 %v1902_v17, %v1787_v59  ;;  %v1905_v37 = vmul.f32 %v1902_v17, %v1807_v2  ;;  %v1906_v53 = vmul.f32 %v1902_v17, %v1827_v57  ;;  %v1907_v38 = vmul.f32 %v1902_v17, %v1847_v63 }
 0x947   :  { %v1911_v60 = vpop.permute.xlu1 %1910 }
 0x948   :  { %v1913_v39 = vadd.f32 %v1911_v60, %v1904_v36  ;;  %v1914_v40 = vadd.f32 %v1911_v60, %v1905_v37  ;;  %v1915_v41 = vadd.f32 %v1911_v60, %v1906_v53  ;;  %v1916_v3 = vadd.f32 %v1911_v60, %v1907_v38  ;;  %v2194_v38 = vld [vmem:[%s3580_s1 + $0x8] sm:$0x77] }
 0x949   :  { %2199 = vst [vmem:[#allocation1 + $0x10] ss:$2 sm:$0xff] %v2194_v38 }
 0x94a   :  { %v1917_v42 = vmul.f32 0.2, %v1913_v39  ;;  %v1918_v6 = vmul.f32 0.2, %v1914_v40  ;;  %v1919_v43 = vmul.f32 0.2, %v1915_v41 }
 0x94b   :  { %v1920_v1 = vmul.f32 0.2, %v1916_v3 }
 0x94c   :  { %v3435_v44 = vmax.f32 %v1913_v39, %v1917_v42  ;;  %v3437_v45 = vmax.f32 %v1914_v40, %v1918_v6  ;;  %v3439_v46 = vmax.f32 %v1915_v41, %v1919_v43 }
 0x94d   :  { %v3441_v47 = vmax.f32 %v1916_v3, %v1920_v1 }
 0x94e   :  { %1925 = vst [vmem:[#allocation2 + $0x8] sm:$0xff] %v3435_v44  ;;  %v2769_v48 = vpack.i.bf16 %v3437_v45, %v3439_v46 }
 0x94f   :  { %1926 = vst [vmem:[#allocation2] sm:$0xff] %v3437_v45  ;;  %v2749_v49 = vpack.i.bf16 %v3315_v18, %v3441_v47  ;;  %v2249_v18 = vld [vmem:[%s3579_s16] sm:$0x7] }
 0x950   :  { %1927 = vst [vmem:[#allocation2 + $0x20] sm:$0xff] %v3439_v46  ;;  %2770 = vrot.lane.b32.xlu0 %v2769_v48, %s2848_s18 }
 0x951   :  { %1928 = vst [vmem:[#allocation2 + $0x10] sm:$0xff] %v3441_v47  ;;  %2750 = vrot.lane.b32.xlu1 %v2749_v49, %s2847_s30  ;;  %2765 = vrot.lane.b32.xlu2 %v2749_v49, %s2849_s20 }
 0x958   :  { %2171 = vrot.lane.b32.xlu0 %v3435_v44, %s2847_s30 }
 0x959   :  { %2755 = vrot.lane.b32.xlu1 %v2749_v49, %s2848_s18  ;;  %2790 = vrot.lane.b32.xlu2 %v2769_v48, %s2850_s21 }
 0x960   :  { %2139 = vrot.lane.b32.xlu0 %v3435_v44, %s2848_s18 }
 0x961   :  { %2760 = vrot.lane.b32.xlu1 %v2769_v48, %s2847_s30  ;;  %2800 = vrot.lane.b32.xlu2 %v2769_v48, %s2851_s22 }
 0x968   :  { %2107 = vrot.lane.b32.xlu0 %v3435_v44, %s2849_s20 }
 0x969   :  { %2775 = vrot.lane.b32.xlu1 %v2749_v49, %s2850_s21  ;;  %2810 = vrot.lane.b32.xlu2 %v2769_v48, %s2852_s23 }
 0x970   :  { %2075 = vrot.lane.b32.xlu0 %v3435_v44, %s2850_s21 }
 0x971   :  { %2780 = vrot.lane.b32.xlu1 %v2769_v48, %s2849_s20  ;;  %2820 = vrot.lane.b32.xlu2 %v2769_v48, %s2853_s24 }
 0x978   :  { %2011 = vrot.lane.b32.xlu0 %v3435_v44, %s2852_s23 }
 0x979   :  { %2785 = vrot.lane.b32.xlu1 %v2749_v49, %s2851_s22  ;;  %2043 = vrot.lane.b32.xlu2 %v3435_v44, %s2851_s22 }
 0x980   :  { %2252 = vperm.xlu0 %2587, %v2249_v18  }
 0x981   :  { %2795 = vrot.lane.b32.xlu1 %v2749_v49, %s2852_s23  ;;  %1947 = vrot.lane.b32.xlu2 %v3435_v44, %s2854_s25 }
 0x989   :  { %2805 = vrot.lane.b32.xlu1 %v2749_v49, %s2853_s24 }
 0x991   :  { %2815 = vrot.lane.b32.xlu1 %v2749_v49, %s2854_s25 }
 0x999   :  { %2825 = vrot.lane.b32.xlu1 %v2769_v48, %s2854_s25 }
 0x9a1   :  { %1979 = vrot.lane.b32.xlu1 %v3435_v44, %s2853_s24 }
 0x9ab   :  { %v2766_v51 = vpop.permute.xlu2 %2765 }
 0x9ac   :  { %v2768_v32 = vunpack.i.h.bf16 %v2766_v51  ;;  %v2767_v11 = vunpack.i.l.bf16 %v2766_v51 }
 0x9ae   :  { %v2120_v5 = vsel %vm262_vm2, %v2767_v11, %v2768_v32 }
 0x9b3   :  { %v3486_v20 = vpop.permute.xlu2 %2790 }
 0x9b4   :  { %v2793_v28 = vunpack.i.h.bf16 %v3486_v20  ;;  %v2792_v29 = vunpack.i.l.bf16 %v3486_v20 }
 0x9b6   :  { %v2086_v41 = vsel %vm229_vm3, %v2793_v28, %v2792_v29 }
 0x9bb   :  { %v3489_v59 = vpop.permute.xlu2 %2800 }
 0x9bc   :  { %v2803_v35 = vunpack.i.h.bf16 %v3489_v59  ;;  %v2802_v0 = vunpack.i.l.bf16 %v3489_v59  ;;  %v2203_v59 = vld.sshfl [vmem:[#allocation1 + $0x18] sm:$0xff pattern:$0x75316420] }
 0x9bd   :  { %2211 = vst [vmem:[#allocation2 + $0x10] sm:$0x7] %v2203_v59 }
 0x9be   :  { %v2054_v1 = vsel %vm196_vm4, %v2803_v35, %v2802_v0 }
 0x9c2   :  { %v2771_v50 = vpop.permute.xlu0 %2770 }
 0x9c3   :  { %v2751_v52 = vpop.permute.xlu1 %2750  ;;  %v3493_v8 = vpop.permute.xlu2 %2810  ;;  %v2773_v10 = vunpack.i.h.bf16 %v2771_v50  ;;  %v2772_v12 = vunpack.i.l.bf16 %v2771_v50 }
 0x9c4   :  { %v2753_v56 = vunpack.i.h.bf16 %v2751_v52  ;;  %v2752_v57 = vunpack.i.l.bf16 %v2751_v52  ;;  %v2813_v60 = vunpack.i.h.bf16 %v3493_v8  ;;  %v2812_v39 = vunpack.i.l.bf16 %v3493_v8  ;;  %v2193_v52 = vld [vmem:[%s3580_s1] sm:$0x77]  ;;  %s2856_s1 = smov 43  }
 0x9c5   :  { %v2150_v33 = vsel %vm295_vm1, %v2773_v10, %v2772_v12  ;;  %2197 = vst [vmem:[#allocation1] ss:$2 sm:$0xff] %v2193_v52 }
 0x9c6   :  { %v2184_v58 = vsel %vm328_vm0, %v2752_v57, %v2753_v56  ;;  %v2022_v50 = vsel %vm163_vm5, %v2813_v60, %v2812_v39 }
 0x9c7   :  { %2325 = vmatpush.msra.mxu3 %v2184_v58 }
 0x9ca   :  { %v2172_v2 = vpop.permute.xlu0 %2171 }
 0x9cb   :  { %v2756_v61 = vpop.permute.xlu1 %2755  ;;  %v3501_v23 = vpop.permute.xlu2 %2820 }
 0x9cc   :  { %v2758_v63 = vunpack.i.h.bf16 %v2756_v61  ;;  %v2757_v24 = vunpack.i.l.bf16 %v2756_v61  ;;  %v2823_v42 = vunpack.i.h.bf16 %v3501_v23  ;;  %v2822_v6 = vunpack.i.l.bf16 %v3501_v23 }
 0x9ce   :  { %v2152_v4 = vsel %vm295_vm1, %v2757_v24, %v2758_v63  ;;  %v2151_v9 = vsel %vm295_vm1, %v2772_v12, %v2757_v24  ;;  %v1990_v56 = vsel %vm130_vm6, %v2823_v42, %v2822_v6  ;;  %v2201_v63 = vld.sshfl [vmem:[#allocation1 + $0x8] sm:$0xff pattern:$0x75316420] }
 0x9cf   :  { %2326 = vmatpush.msra.mxu3 %v2152_v4  ;;  %2209 = vst [vmem:[#allocation2] sm:$0x7] %v2201_v63 }
 0x9d1   :  { %2327 = vmatpush.msra.mxu3 %v2120_v5  ;;  %v2200_v5 = vld.sshfl [vmem:[#allocation1] sm:$0xff pattern:$0x75316420] }
 0x9d2   :  { %v2140_v7 = vpop.permute.xlu0 %2139  ;;  %2208 = vst [vmem:[#allocation2 + $0x8] sm:$0x7] %v2200_v5 }
 0x9d3   :  { %v2761_v31 = vpop.permute.xlu1 %2760  ;;  %v2149_v15 = vsel %vm295_vm1, %v2140_v7, %v2773_v10  ;;  %v2044_v53 = vpop.permute.xlu2 %2043  ;;  %v2345_v7 = vld [vmem:[#allocation2 + $0x10] sm:$0x7]  ;;  %vm2381_vm1 = vcmask 1043456  }
 0x9d4   :  { %v2763_v62 = vunpack.i.h.bf16 %v2761_v31  ;;  %v2762_v54 = vunpack.i.l.bf16 %v2761_v31  ;;  %v2053_v43 = vsel %vm196_vm4, %v2044_v53, %v2803_v35  ;;  %2358 = vrot.lane.b32.xlu0 %v2345_v7, %s2856_s1 }
 0x9d6   :  { %v2181_v55 = vsel %vm328_vm0, %v2172_v2, %v2763_v62  ;;  %v2182_v13 = vsel %vm328_vm0, %v2763_v62, %v2762_v54  ;;  %v2183_v14 = vsel %vm328_vm0, %v2762_v54, %v2752_v57  ;;  %v2202_v2 = vld.sshfl [vmem:[#allocation1 + $0x10] sm:$0xff pattern:$0x75316420]  ;;  %v2343_v62 = vld [vmem:[#allocation2] sm:$0x7]  ;;  %vm2362_vm0 = vcmask 351232  }
 0x9d7   :  { %2265 = vmatpush.msra.mxu0 %v2181_v55  ;;  %2285 = vmatpush.msra.mxu1 %v2182_v13  ;;  %2210 = vst [vmem:[#allocation2 + $0x20] sm:$0x7] %v2202_v2 }
 0x9d8   :  { %2305 = vmatpush.msra.mxu2 %v2183_v14  ;;  %2354 = vrot.lane.b32.xlu1 %v2343_v62, %s2856_s1  ;;  %v2346_v14 = vld [vmem:[#allocation2 + $0x18] sm:$0x7] }
 0x9d9   :  { %2266 = vmatpush.msra.mxu0 %v2149_v15  ;;  %2286 = vmatpush.msra.mxu1 %v2150_v33  ;;  %v2342_v13 = vld [vmem:[#allocation2 + $0x8] sm:$0x7] }
 0x9da   :  { %2306 = vmatpush.msra.mxu2 %v2151_v9  ;;  %v2108_v19 = vpop.permute.xlu0 %2107 }
 0x9db   :  { %v2776_v34 = vpop.permute.xlu1 %2775 }
 0x9dc   :  { %v2778_v21 = vunpack.i.h.bf16 %v2776_v34  ;;  %v2777_v22 = vunpack.i.l.bf16 %v2776_v34  ;;  %v2212_v34 = vld [vmem:[%s3581_s15] sm:$0x7] }
 0x9de   :  { %v2088_v25 = vsel %vm229_vm3, %v2777_v22, %v2778_v21  ;;  %v2087_v3 = vsel %vm229_vm3, %v2792_v29, %v2777_v22  ;;  %v2344_v8 = vld [vmem:[#allocation2 + $0x20] sm:$0x7]  ;;  %v1948_v29 = vpop.permute.xlu2 %1947 }
 0x9df   :  { %2328 = vmatpush.msra.mxu3 %v2088_v25  ;;  %2356 = vrot.lane.b32.xlu2 %v2344_v8, %s2856_s1 }
 0x9e0   :  { %2360 = vrot.lane.b32.xlu1 %v2346_v14, %s2856_s1 }
 0x9e2   :  { %v2076_v16 = vpop.permute.xlu0 %2075 }
 0x9e3   :  { %v2781_v27 = vpop.permute.xlu1 %2780  ;;  %v2085_v40 = vsel %vm229_vm3, %v2076_v16, %v2793_v28 }
 0x9e4   :  { %v2783_v26 = vunpack.i.h.bf16 %v2781_v27  ;;  %v2782_v30 = vunpack.i.l.bf16 %v2781_v27 }
 0x9e6   :  { %v2117_v17 = vsel %vm262_vm2, %v2108_v19, %v2783_v26  ;;  %v2118_v36 = vsel %vm262_vm2, %v2783_v26, %v2782_v30  ;;  %v2119_v37 = vsel %vm262_vm2, %v2782_v30, %v2767_v11 }
 0x9e7   :  { %2267 = vmatpush.msra.mxu0 %v2117_v17  ;;  %2287 = vmatpush.msra.mxu1 %v2118_v36 }
 0x9e8   :  { %2307 = vmatpush.msra.mxu2 %v2119_v37  ;;  %2352 = vrot.lane.b32.xlu2 %v2342_v13, %s2856_s1 }
 0x9e9   :  { %2268 = vmatpush.msra.mxu0 %v2085_v40  ;;  %2288 = vmatpush.msra.mxu1 %v2086_v41 }
 0x9ea   :  { %2308 = vmatpush.msra.mxu2 %v2087_v3  ;;  %v2012_v48 = vpop.permute.xlu0 %2011 }
 0x9eb   :  { %v2786_v49 = vpop.permute.xlu1 %2785  ;;  %2269 = vmatpush.msra.mxu0 %v2053_v43  ;;  %2289 = vmatpush.msra.mxu1 %v2054_v1  ;;  %v2021_v18 = vsel %vm163_vm5, %v2012_v48, %v2813_v60 }
 0x9ec   :  { %v2788_v51 = vunpack.i.h.bf16 %v2786_v49  ;;  %v2787_v20 = vunpack.i.l.bf16 %v2786_v49 }
 0x9ed   :  { %2270 = vmatpush.msra.mxu0 %v2021_v18  ;;  %2290 = vmatpush.msra.mxu1 %v2022_v50 }
 0x9ee   :  { %v2055_v57 = vsel %vm196_vm4, %v2802_v0, %v2787_v20  ;;  %v2056_v58 = vsel %vm196_vm4, %v2787_v20, %v2788_v51 }
 0x9ef   :  { %2291 = vmatpush.msra.mxu1 %v1990_v56  ;;  %2309 = vmatpush.msra.mxu2 %v2055_v57 }
 0x9f0   :  { %2329 = vmatpush.msra.mxu3 %v2056_v58 }
 0x9f3   :  { %v2796_v61 = vpop.permute.xlu1 %2795 }
 0x9f4   :  { %v2798_v32 = vunpack.i.h.bf16 %v2796_v61  ;;  %v2797_v11 = vunpack.i.l.bf16 %v2796_v61 }
 0x9f6   :  { %v2023_v24 = vsel %vm163_vm5, %v2812_v39, %v2797_v11  ;;  %v2024_v4 = vsel %vm163_vm5, %v2797_v11, %v2798_v32 }
 0x9f7   :  { %2310 = vmatpush.msra.mxu2 %v2023_v24  ;;  %2330 = vmatpush.msra.mxu3 %v2024_v4 }
 0x9fb   :  { %v2806_v31 = vpop.permute.xlu1 %2805 }
 0x9fc   :  { %v2808_v10 = vunpack.i.h.bf16 %v2806_v31  ;;  %v2807_v12 = vunpack.i.l.bf16 %v2806_v31 }
 0x9fe   :  { %v1991_v54 = vsel %vm130_vm6, %v2822_v6, %v2807_v12  ;;  %v1992_v55 = vsel %vm130_vm6, %v2807_v12, %v2808_v10 }
 0x9ff   :  { %2311 = vmatpush.msra.mxu2 %v1991_v54  ;;  %2331 = vmatpush.msra.mxu3 %v1992_v55 }
 0xa03   :  { %v2816_v15 = vpop.permute.xlu1 %2815 }
 0xa04   :  { %v2818_v33 = vunpack.i.h.bf16 %v2816_v15  ;;  %v2817_v9 = vunpack.i.l.bf16 %v2816_v15 }
 0xa06   :  { %v1960_v19 = vsel %vm97_vm7, %v2817_v9, %v2818_v33 }
 0xa07   :  { %2332 = vmatpush.msra.mxu3 %v1960_v19 }
 0xa09   :  { %2333 = vmatpush.msra.mxu3 %v3441_v47 }
 0xa0a   :  { %2414 = vmatmul.msk.f32.vlgmr.msra.gmra.mxu3 %vm378_vm8, %v2212_v34 }
 0xa0b   :  { %v2826_v21 = vpop.permute.xlu1 %2825 }
 0xa0c   :  { %v2828_v22 = vunpack.i.h.bf16 %v2826_v21  ;;  %v2827_v25 = vunpack.i.l.bf16 %v2826_v21 }
 0xa0e   :  { %v1958_v16 = vsel %vm97_vm7, %v2828_v22, %v2827_v25  ;;  %v1959_v27 = vsel %vm97_vm7, %v2827_v25, %v2817_v9  ;;  %v1957_v26 = vsel %vm97_vm7, %v1948_v29, %v2828_v22 }
 0xa0f   :  { %2292 = vmatpush.msra.mxu1 %v1958_v16  ;;  %2312 = vmatpush.msra.mxu2 %v1959_v27 }
 0xa11   :  { %2293 = vmatpush.msra.mxu1 %v3437_v45  ;;  %2313 = vmatpush.msra.mxu2 %v3439_v46  ;;  %v2253_v46 = vpop.permute.xlu0 %2252 }
 0xa12   :  { %2412 = vmatmul.msk.f32.vlgmr.msra.gmra.mxu1 %vm378_vm8, %v2212_v34  ;;  %2413 = vmatmul.msk.f32.vlgmr.msra.gmra.mxu2 %vm378_vm8, %v2212_v34 }
 0xa13   :  { %v1980_v47 = vpop.permute.xlu1 %1979 }
 0xa14   :  { %v1989_v28 = vsel %vm130_vm6, %v1980_v47, %v2823_v42 }
 0xa15   :  { %2271 = vmatpush.msra.mxu0 %v1989_v28 }
 0xa17   :  { %2272 = vmatpush.msra.mxu0 %v1957_v26 }
 0xa19   :  { %2273 = vmatpush.msra.mxu0 %v3435_v44 }
 0xa1a   :  { %2411 = vmatmul.msk.f32.vlgmr.msra.gmra.mxu0 %vm378_vm8, %v2212_v34 }
 0xa39   :  { %v2357_v36 = vpop.permute.xlu2 %2356 }
 0xa42   :  { %v2353_v43 = vpop.permute.xlu2 %2352 }
 0xa46   :  { %v2359_v23 = vpop.permute.xlu0 %2358 }
 0xa47   :  { %v2365_v48 = vsel %vm2362_vm0, %v2357_v36, %v2359_v23 }
 0xa4a   :  { %v2355_v45 = vpop.permute.xlu1 %2354 }
 0xa4b   :  { %v2364_v42 = vsel %vm2362_vm0, %v2355_v45, %v2357_v36  ;;  %v2363_v20 = vsel %vm2362_vm0, %v2353_v43, %v2355_v45 }
 0xa52   :  { %v2361_v53 = vpop.permute.xlu1 %2360 }
 0xa53   :  { %v2366_v44 = vsel %vm2362_vm0, %v2359_v23, %v2361_v53 }
 0xa8d   :  { %v2335_v30 = vpop.f32.mrf.mxu3 }
 0xa8e   :  { %v2336_v35 = vadd.f32 %v2335_v30, %v2253_v46 }
 0xa8f   :  { %v2295_v0 = vpop.f32.mrf.mxu1 }
 0xa90   :  { %v2296_v17 = vadd.f32 %v2295_v0, %v2253_v46  ;;  %2837 = vtanh.f32 %v2336_v35 }
 0xa92   :  { %2839 = vtanh.f32 %v2296_v17 }
 0xa95   :  { %v2315_v37 = vpop.f32.mrf.mxu2 }
 0xa96   :  { %v2316_v38 = vadd.f32 %v2315_v37, %v2253_v46  ;;  %v2838_v39 = vpop.eup %2837 }
 0xa97   :  { %v2275_v60 = vpop.f32.mrf.mxu0  ;;  %v2374_v3 = vadd.f32 %v2838_v39, %v2366_v44 }
 0xa98   :  { %2841 = vtanh.f32 %v2316_v38  ;;  %v2276_v40 = vadd.f32 %v2275_v60, %v2253_v46  ;;  %v2840_v41 = vpop.eup %2839 }
 0xa99   :  { %v2372_v6 = vadd.f32 %v2840_v41, %v2364_v42  ;;  %v2380_v18 = vrot.slane %v2374_v3, 4 }
 0xa9a   :  { %2843 = vtanh.f32 %v2276_v40 }
 0xa9b   :  { %v2379_v50 = vrot.slane %v2372_v6, 4 }
 0xa9e   :  { %v2842_v1 = vpop.eup %2841 }
 0xa9f   :  { %v2373_v49 = vadd.f32 %v2842_v1, %v2365_v48 }
 0xaa0   :  { %v2844_v51 = vpop.eup %2843 }
 0xaa1   :  { %v2383_v52 = vsel %vm2381_vm1, %v2373_v49, %v2380_v18  ;;  %v2371_v56 = vadd.f32 %v2844_v51, %v2363_v20 }
 0xaa2   :  { %2387 = vst [vmem:[%s3582_s17 + $0x8] sm:$0x77] %v2383_v52 }
 0xaa3   :  { %v2382_v57 = vsel %vm2381_vm1, %v2371_v56, %v2379_v50 }
 0xaa4   :  { %2386 = vst [vmem:[%s3582_s17] sm:$0x77] %v2382_v57 }

</bundles_post_ra>
